<compile_context>
chip_gen: v6e
topology: v6e:2x2x1
jax: 0.10.0
libtpu: 0.0.40
codegen_flags: <defaults>
</compile_context>

<pallas_src>
import math
import functools

import jax
import jax.numpy as jnp
from jax.experimental import pallas as pl
from jax.experimental.pallas import tpu as pltpu


# ----------------------------------------------------------------------------
# small helpers
# ----------------------------------------------------------------------------

def _round_up(x, m):
    return (x + m - 1) // m * m


def _divisor_tile(dim, target, quantum):
    """Largest multiple-of-`quantum` divisor of `dim` that is <= target.
    Returns `dim` (full block, always legal) when dim <= target or when no
    suitable divisor exists."""
    if dim <= target:
        return dim
    start = target - (target % quantum)
    for t in range(start, quantum - 1, -quantum):
        if dim % t == 0:
            return t
    return dim


@functools.lru_cache(maxsize=None)
def _vmem_limit():
    """Per-generation scoped-VMEM budget (v7x: ~48 MiB of 64; v6e/v5e: ~110 MiB)."""
    try:
        info_fn = getattr(pltpu, "get_tpu_info", None)
        if info_fn is not None:
            cap = getattr(info_fn(), "vmem_capacity_bytes", None)
            if cap:
                return int(max(32 << 20, min(cap - (16 << 20), 110 << 20)))
    except Exception:
        pass
    return 48 << 20


# ----------------------------------------------------------------------------
# matmul kernels (fused bias / ReLU / residual+LayerNorm epilogues)
# ----------------------------------------------------------------------------

def _ln_epilogue(y, g_ref, beta_ref):
    mean = jnp.mean(y, axis=-1, keepdims=True)
    var = jnp.mean(jnp.square(y - mean), axis=-1, keepdims=True)
    return ((y - mean) * jax.lax.rsqrt(var + 1e-5)
            * g_ref[...].astype(jnp.float32)
            + beta_ref[...].astype(jnp.float32))


def _mm_bias_kernel(x_ref, w_ref, b_ref, o_ref, acc_ref, *, relu):
    # multi-K-step: f32 VMEM accumulator, init/finalize on the K axis
    @pl.when(pl.program_id(2) == 0)
    def _():
        acc_ref[...] = jnp.zeros_like(acc_ref)

    acc_ref[...] += jnp.dot(x_ref[...], w_ref[...],
                            preferred_element_type=jnp.float32)

    @pl.when(pl.program_id(2) == pl.num_programs(2) - 1)
    def _():
        y = acc_ref[...] + b_ref[...].astype(jnp.float32)
        if relu:
            y = jnp.maximum(y, 0.0)
        o_ref[...] = y.astype(o_ref.dtype)


def _mm_bias_kernel_1k(x_ref, w_ref, b_ref, o_ref, *, relu):
    # single K step: no accumulator scratch / zero-fill round trip
    y = jnp.dot(x_ref[...], w_ref[...], preferred_element_type=jnp.float32)
    y = y + b_ref[...].astype(jnp.float32)
    if relu:
        y = jnp.maximum(y, 0.0)
    o_ref[...] = y.astype(o_ref.dtype)


def _mm_bias_ln_kernel(x_ref, w_ref, b_ref, res_ref, g_ref, beta_ref,
                       o_ref, acc_ref):
    @pl.when(pl.program_id(2) == 0)
    def _():
        acc_ref[...] = jnp.zeros_like(acc_ref)

    acc_ref[...] += jnp.dot(x_ref[...], w_ref[...],
                            preferred_element_type=jnp.float32)

    @pl.when(pl.program_id(2) == pl.num_programs(2) - 1)
    def _():
        y = (acc_ref[...]
             + b_ref[...].astype(jnp.float32)
             + res_ref[...].astype(jnp.float32))
        o_ref[...] = _ln_epilogue(y, g_ref, beta_ref).astype(o_ref.dtype)


def _mm_bias_ln_kernel_1k(x_ref, w_ref, b_ref, res_ref, g_ref, beta_ref, o_ref):
    y = jnp.dot(x_ref[...], w_ref[...], preferred_element_type=jnp.float32)
    y = y + b_ref[...].astype(jnp.float32) + res_ref[...].astype(jnp.float32)
    o_ref[...] = _ln_epilogue(y, g_ref, beta_ref).astype(o_ref.dtype)


def linear_fused(x, w, b, *, relu=False, residual=None, ln_gamma=None,
                 ln_beta=None, out_dtype=jnp.bfloat16,
                 tm_target=512, tn_target=512, tk_target=512):
    """x:[M,K] bf16, w:[K,N] bf16 (pre-transposed), b:[N] f32 -> [M,N].

    Fused epilogues: optional ReLU, or bias + residual + LayerNorm.
    Dims larger than the tile target are padded to a tile multiple (never a
    full-dim tile fallback); dims <= target use a single full-dim block.
    """
    M, K = x.shape
    Kw, N = w.shape
    assert K == Kw
    fuse_ln = ln_gamma is not None

    tm = M if M <= tm_target else tm_target
    tk = K if K <= tk_target else tk_target
    # LayerNorm needs the whole feature row resident; N = d_model, always fits.
    tn = N if (fuse_ln or N <= tn_target) else tn_target

    Mp, Kp, Np = _round_up(M, tm), _round_up(K, tk), _round_up(N, tn)
    if (Mp, Kp) != (M, K):
        x = jnp.pad(x, ((0, Mp - M), (0, Kp - K)))
    if (Kp, Np) != (K, N):
        w = jnp.pad(w, ((0, Kp - K), (0, Np - N)))
    b2 = b.reshape(1, N).astype(jnp.float32)
    if Np != N:
        b2 = jnp.pad(b2, ((0, 0), (0, Np - N)))

    gm, gn, gk = Mp // tm, Np // tn, Kp // tk

    flops = 2 * Mp * Np * Kp
    bytes_accessed = (Mp * Kp * x.dtype.itemsize
                      + Kp * Np * w.dtype.itemsize
                      + Mp * Np * jnp.dtype(out_dtype).itemsize)

    extra_args = ()
    if fuse_ln:
        if Mp != M:
            residual = jnp.pad(residual, ((0, Mp - M), (0, 0)))
        extra_args = (residual,
                      ln_gamma.reshape(1, N).astype(jnp.float32),
                      ln_beta.reshape(1, N).astype(jnp.float32))
        bytes_accessed += Mp * Np * residual.dtype.itemsize

    cost = pl.CostEstimate(flops=flops, transcendentals=0,
                           bytes_accessed=bytes_accessed)

    if gk == 1:
        # ---- single-K path: 2-D grid, no accumulator scratch ----
        in_specs = [pl.BlockSpec((tm, tk), lambda i, j: (i, 0)),
                    pl.BlockSpec((tk, tn), lambda i, j: (0, j)),
                    pl.BlockSpec((1, tn), lambda i, j: (0, j))]
        if fuse_ln:
            in_specs += [pl.BlockSpec((tm, tn), lambda i, j: (i, j)),
                         pl.BlockSpec((1, tn), lambda i, j: (0, j)),
                         pl.BlockSpec((1, tn), lambda i, j: (0, j))]
            kernel = _mm_bias_ln_kernel_1k
        else:
            kernel = functools.partial(_mm_bias_kernel_1k, relu=relu)

        out = pl.pallas_call(
            kernel,
            out_shape=jax.ShapeDtypeStruct((Mp, Np), out_dtype),
            grid_spec=pltpu.PrefetchScalarGridSpec(
                num_scalar_prefetch=0, grid=(gm, gn),
                in_specs=in_specs,
                out_specs=pl.BlockSpec((tm, tn), lambda i, j: (i, j))),
            compiler_params=pltpu.CompilerParams(
                dimension_semantics=("parallel", "parallel"),
                vmem_limit_bytes=_vmem_limit()),
            cost_estimate=cost,
        )(x, w, b2, *extra_args)
    else:
        # ---- multi-K path: 3-D grid, f32 accumulator scratch ----
        in_specs = [pl.BlockSpec((tm, tk), lambda i, j, k: (i, k)),
                    pl.BlockSpec((tk, tn), lambda i, j, k: (k, j)),
                    pl.BlockSpec((1, tn), lambda i, j, k: (0, j))]
        if fuse_ln:
            in_specs += [pl.BlockSpec((tm, tn), lambda i, j, k: (i, j)),
                         pl.BlockSpec((1, tn), lambda i, j, k: (0, j)),
                         pl.BlockSpec((1, tn), lambda i, j, k: (0, j))]
            kernel = _mm_bias_ln_kernel
        else:
            kernel = functools.partial(_mm_bias_kernel, relu=relu)

        out = pl.pallas_call(
            kernel,
            out_shape=jax.ShapeDtypeStruct((Mp, Np), out_dtype),
            grid_spec=pltpu.PrefetchScalarGridSpec(
                num_scalar_prefetch=0, grid=(gm, gn, gk),
                in_specs=in_specs,
                out_specs=pl.BlockSpec((tm, tn), lambda i, j, k: (i, j)),
                scratch_shapes=[pltpu.VMEM((tm, tn), jnp.float32)]),
            compiler_params=pltpu.CompilerParams(
                dimension_semantics=("parallel", "parallel", "arbitrary"),
                vmem_limit_bytes=_vmem_limit()),
            cost_estimate=cost,
        )(x, w, b2, *extra_args)

    if (Mp, Np) != (M, N):
        out = out[:M, :N]
    return out


# ----------------------------------------------------------------------------
# flash-style attention: grid (B, H, kv-tiles), online softmax,
# per-head q/k/v sliced by the BlockSpec DMA (head-major layout).
# ----------------------------------------------------------------------------

def _flash_attn_kernel(mask_ref, q_ref, k_ref, v_ref, o_ref,
                       m_ref, l_ref, acc_ref):
    kv = pl.program_id(2)

    @pl.when(kv == 0)
    def _():
        m_ref[...] = jnp.full(m_ref.shape, -jnp.inf, m_ref.dtype)
        l_ref[...] = jnp.zeros(l_ref.shape, l_ref.dtype)
        acc_ref[...] = jnp.zeros(acc_ref.shape, acc_ref.dtype)

    q = q_ref[0, 0, 0]                       # [S, Dh] bf16 (1/sqrt(Dh) pre-folded)
    k = k_ref[0, 0, 0]                       # [tkv, Dh]
    v = v_ref[0, 0, 0]                       # [tkv, Dh]

    # q @ k^T without materializing a transpose (contract the last dims)
    s = jax.lax.dot_general(q, k, (((1,), (1,)), ((), ())),
                            preferred_element_type=jnp.float32)
    s = s + mask_ref[...]                    # [S, tkv] f32 additive mask tile

    m_prev = m_ref[...]
    m_new = jnp.maximum(m_prev, jnp.max(s, axis=-1, keepdims=True))
    alpha = jnp.exp(m_prev - m_new)
    p = jnp.exp(s - m_new)
    l_ref[...] = alpha * l_ref[...] + jnp.sum(p, axis=-1, keepdims=True)
    acc_ref[...] = alpha * acc_ref[...] + jnp.dot(
        p.astype(v.dtype), v, preferred_element_type=jnp.float32)
    m_ref[...] = m_new

    @pl.when(kv == pl.num_programs(2) - 1)
    def _():
        # exact divide (addresses the approx-reciprocal correctness concern)
        o_ref[0, 0] = (acc_ref[...] / l_ref[...]).astype(o_ref.dtype)


def flash_attention(qkv_h, mask, *, tkv_target=1024, out_dtype=jnp.bfloat16):
    """qkv_h: [3, B, H, S, Dh] bf16 (head-major, scale folded into q),
    mask: [S, S] additive f32  ->  [B, H, S, Dh]."""
    _, B, H, S, Dh = qkv_h.shape
    # kv tile: multiple of 128 (mask lane dim) or the full S.
    tkv = _divisor_tile(S, tkv_target, 128)
    nkv = S // tkv
    # TODO(synk): for very long S also tile the q axis (true flash) so the
    # [S, tkv] score slab and the resident mask stay bounded on v7x.

    flops = 4 * B * H * S * S * Dh
    bytes_accessed = (qkv_h.size * qkv_h.dtype.itemsize
                      + B * H * S * Dh * jnp.dtype(out_dtype).itemsize
                      + B * H * nkv * S * tkv * 4)

    return pl.pallas_call(
        _flash_attn_kernel,
        grid=(B, H, nkv),
        in_specs=[
            pl.BlockSpec((S, tkv), lambda b, h, kv: (0, kv)),
            pl.BlockSpec((1, 1, 1, S, Dh), lambda b, h, kv: (0, b, h, 0, 0)),
            pl.BlockSpec((1, 1, 1, tkv, Dh), lambda b, h, kv: (1, b, h, kv, 0)),
            pl.BlockSpec((1, 1, 1, tkv, Dh), lambda b, h, kv: (2, b, h, kv, 0)),
        ],
        out_specs=pl.BlockSpec((1, 1, S, Dh), lambda b, h, kv: (b, h, 0, 0)),
        out_shape=jax.ShapeDtypeStruct((B, H, S, Dh), out_dtype),
        scratch_shapes=[pltpu.VMEM((S, 1), jnp.float32),
                        pltpu.VMEM((S, 1), jnp.float32),
                        pltpu.VMEM((S, Dh), jnp.float32)],
        compiler_params=pltpu.CompilerParams(
            dimension_semantics=("parallel", "parallel", "arbitrary"),
            vmem_limit_bytes=_vmem_limit()),
        cost_estimate=pl.CostEstimate(
            flops=flops, transcendentals=B * H * S * S,
            bytes_accessed=bytes_accessed),
    )(mask, qkv_h, qkv_h, qkv_h)


# ----------------------------------------------------------------------------
# positional-encoding add (tiled; sqrt(d_model) already folded into embedding)
# ----------------------------------------------------------------------------

def _add_pe_kernel(x_ref, pe_ref, o_ref):
    o_ref[...] = (x_ref[...].astype(jnp.float32) + pe_ref[...]).astype(o_ref.dtype)


def add_positional_encoding(x, pe):
    """x: [B, S, D] bf16 (pre-scaled embeddings), pe: [1, S, D] f32."""
    B, S, D = x.shape
    ts = _divisor_tile(S, 256, 8)
    return pl.pallas_call(
        _add_pe_kernel,
        grid=(B, S // ts),
        in_specs=[pl.BlockSpec((1, ts, D), lambda b, s: (b, s, 0)),
                  pl.BlockSpec((1, ts, D), lambda b, s: (0, s, 0))],
        out_specs=pl.BlockSpec((1, ts, D), lambda b, s: (b, s, 0)),
        out_shape=jax.ShapeDtypeStruct((B, S, D), jnp.bfloat16),
        compiler_params=pltpu.CompilerParams(
            dimension_semantics=("parallel", "parallel"),
            vmem_limit_bytes=_vmem_limit()),
    )(x, pe)


# ----------------------------------------------------------------------------
# model forward (matches nn.TransformerEncoderLayer defaults: post-norm, ReLU,
# no final encoder norm; dropout = identity in eval mode)
# ----------------------------------------------------------------------------

def positional_encoding(seq_len, d_model):
    position = jnp.arange(seq_len, dtype=jnp.float32)[:, None]
    div_term = jnp.exp(
        jnp.arange(0, d_model, 2, dtype=jnp.float32)
        * (-math.log(10000.0) / d_model))
    pe = jnp.zeros((1, seq_len, d_model), dtype=jnp.float32)
    pe = pe.at[0, :, 0::2].set(jnp.sin(position * div_term))
    pe = pe.at[0, :, 1::2].set(jnp.cos(position * div_term))
    return pe


def encoder_layer_forward(x, src_mask, p, nhead):
    """One TransformerEncoderLayer.  x: [B, S, D] bf16."""
    B, S, D = x.shape
    Dh = D // nhead
    x_flat = x.reshape(B * S, D)

    # --- self-attention block: qkv proj -> flash attention -> out_proj+res+LN1
    qkv = linear_fused(x_flat, p["in_proj_w"], p["in_proj_b"])        # [B*S, 3D]
    # head-major layout so the attention BlockSpec DMA slices whole heads
    qkv_h = qkv.reshape(B, S, 3, nhead, Dh).transpose(2, 0, 3, 1, 4)  # [3,B,H,S,Dh]
    attn = flash_attention(qkv_h, src_mask)                           # [B,H,S,Dh]
    attn_flat = attn.transpose(0, 2, 1, 3).reshape(B * S, D)
    x_flat = linear_fused(attn_flat, p["out_proj_w"], p["out_proj_b"],
                          residual=x_flat,
                          ln_gamma=p["ln1_g"], ln_beta=p["ln1_b"])    # [B*S, D]

    # --- feed-forward block: ffn1+ReLU -> ffn2+res+LN2 (all fused) ---
    h = linear_fused(x_flat, p["ffn1_w"], p["ffn1_b"], relu=True)     # [B*S, d_hid]
    x_flat = linear_fused(h, p["ffn2_w"], p["ffn2_b"],
                          residual=x_flat,
                          ln_gamma=p["ln2_g"], ln_beta=p["ln2_b"])    # [B*S, D]
    return x_flat.reshape(B, S, D)


def transformer_forward(src, src_mask, params, d_model, nhead):
    """src: [S, B] int32, src_mask: [S, S] additive f32.
    Returns logits [S, B, ntokens] (f32)."""
    S, B = src.shape

    # embedding gather (XLA glue); sqrt(d_model) already folded into the table
    emb = params["embedding"][src.T]                       # [B, S, D] bf16
    pe = positional_encoding(S, d_model)                   # [1, S, D] f32
    x = add_positional_encoding(emb, pe)                   # [B, S, D] bf16

    mask = src_mask.astype(jnp.float32)
    for layer_p in params["layers"]:
        x = encoder_layer_forward(x, mask, layer_p, nhead)

    # seq-major for the decoder so logits land directly in [S, B, V]
    # (transpose the small [B,S,D] slab, never the huge logits tensor)
    x_sb = x.transpose(1, 0, 2).reshape(S * B, d_model)
    logits = linear_fused(x_sb, params["dec_w"], params["dec_b"],
                          out_dtype=jnp.float32)           # [S*B, ntokens]
    return logits.reshape(S, B, -1)


# ----------------------------------------------------------------------------
# deterministic parameter init.  Weights stored PRE-TRANSPOSED as [Din, Dout]
# bf16 (no per-call w.T); 1/sqrt(Dh) folded into the q projection; sqrt(d_model)
# folded into the embedding table.  Biases / LN params in f32.
# ----------------------------------------------------------------------------

def init_params(key, ntokens, d_model, nhead, d_hid, nlayers):
    initrange = 0.1
    head_dim = d_model // nhead
    qk_scale = 1.0 / math.sqrt(head_dim)
    k_emb, k_dec, k_layers = jax.random.split(key, 3)
    params = {
        "embedding": (jax.random.uniform(
            k_emb, (ntokens, d_model), jnp.float32, -initrange, initrange)
            * math.sqrt(d_model)).astype(jnp.bfloat16),
        "dec_w": jax.random.uniform(
            k_dec, (d_model, ntokens), jnp.float32,
            -initrange, initrange).astype(jnp.bfloat16),
        "dec_b": jnp.zeros((ntokens,), jnp.float32),
        "layers": [],
    }
    lkeys = jax.random.split(k_layers, nlayers)
    for lk in lkeys:
        ks = jax.random.split(lk, 4)
        bound_d = 1.0 / math.sqrt(d_model)
        bound_h = 1.0 / math.sqrt(d_hid)
        in_proj = jax.random.uniform(
            ks[0], (d_model, 3 * d_model), jnp.float32, -bound_d, bound_d)
        # fold the attention 1/sqrt(Dh) scale into the q columns (+ q bias,
        # which is zero here) so the kernel never rescales q.
        in_proj = in_proj.at[:, :d_model].multiply(qk_scale)
        layer = {
            "in_proj_w": in_proj.astype(jnp.bfloat16),
            "in_proj_b": jnp.zeros((3 * d_model,), jnp.float32),
            "out_proj_w": jax.random.uniform(
                ks[1], (d_model, d_model), jnp.float32,
                -bound_d, bound_d).astype(jnp.bfloat16),
            "out_proj_b": jnp.zeros((d_model,), jnp.float32),
            "ffn1_w": jax.random.uniform(
                ks[2], (d_model, d_hid), jnp.float32,
                -bound_d, bound_d).astype(jnp.bfloat16),
            "ffn1_b": jnp.zeros((d_hid,), jnp.float32),
            "ffn2_w": jax.random.uniform(
                ks[3], (d_hid, d_model), jnp.float32,
                -bound_h, bound_h).astype(jnp.bfloat16),
            "ffn2_b": jnp.zeros((d_model,), jnp.float32),
            "ln1_g": jnp.ones((d_model,), jnp.float32),
            "ln1_b": jnp.zeros((d_model,), jnp.float32),
            "ln2_g": jnp.ones((d_model,), jnp.float32),
            "ln2_b": jnp.zeros((d_model,), jnp.float32),
        }
        params["layers"].append(layer)
    return params


# ----------------------------------------------------------------------------
# main
# ----------------------------------------------------------------------------

if __name__ == "__main__":
    # small shapes consistent with the module's forward signature
    ntokens, d_model, nhead, d_hid, nlayers = 64, 32, 2, 64, 2
    S, B = 8, 2

    key = jax.random.PRNGKey(0)
    k_params, k_src, k_t1, k_t2 = jax.random.split(key, 4)
    params = init_params(k_params, ntokens, d_model, nhead, d_hid, nlayers)

    src = jax.random.randint(k_src, (S, B), 0, ntokens, dtype=jnp.int32)
    # causal additive float mask (like generate_square_subsequent_mask);
    # -1e9 stands in for -inf for TPU-safe softmax.
    src_mask = jnp.where(
        jnp.arange(S)[None, :] <= jnp.arange(S)[:, None], 0.0, -1e9
    ).astype(jnp.float32)

    fwd = jax.jit(
        functools.partial(transformer_forward, d_model=d_model, nhead=nhead)
    )
    out = fwd(src, src_mask, params)
    jax.block_until_ready(out)
    assert out.shape == (S, B, ntokens), out.shape
    assert bool(jnp.all(jnp.isfinite(out)))

    # --- self-test (a): padded + multi-K-step accumulating matmul path ------
    xt = jax.random.normal(k_t1, (72, 384), jnp.float32).astype(jnp.bfloat16)
    wt = (jax.random.normal(k_t2, (384, 320), jnp.float32) * 0.05
          ).astype(jnp.bfloat16)
    bt = jnp.zeros((320,), jnp.float32)
    got = linear_fused(xt, wt, bt, out_dtype=jnp.float32,
                       tm_target=32, tn_target=128, tk_target=128)
    want = jnp.dot(xt.astype(jnp.float32), wt.astype(jnp.float32)) + bt
    jax.block_until_ready(got)
    assert got.shape == want.shape
    assert bool(jnp.allclose(got, want, rtol=5e-2, atol=5e-2))

    # --- self-test (b): multi-kv-step online-softmax attention path ---------
    Bt, Ht, St, Dht = 2, 2, 256, 16
    kq, kk, kv = jax.random.split(k_t2, 3)
    qh = (jax.random.normal(kq, (Bt, Ht, St, Dht), jnp.float32) * 0.3
          ).astype(jnp.bfloat16)
    kh = (jax.random.normal(kk, (Bt, Ht, St, Dht), jnp.float32) * 0.3
          ).astype(jnp.bfloat16)
    vh = (jax.random.normal(kv, (Bt, Ht, St, Dht), jnp.float32) * 0.3
          ).astype(jnp.bfloat16)
    qkv_h = jnp.stack([qh, kh, vh], axis=0)                     # [3,B,H,S,Dh]
    mt = jnp.where(jnp.arange(St)[None, :] <= jnp.arange(St)[:, None],
                   0.0, -1e9).astype(jnp.float32)
    got_a = flash_attention(qkv_h, mt, tkv_target=128)          # 2 kv steps
    sc = jnp.einsum("bhqd,bhkd->bhqk",
                    qh.astype(jnp.float32), kh.astype(jnp.float32)) + mt
    pr = jax.nn.softmax(sc, axis=-1)
    want_a = jnp.einsum("bhqk,bhkd->bhqd", pr, vh.astype(jnp.float32))
    jax.block_until_ready(got_a)
    assert bool(jnp.allclose(got_a.astype(jnp.float32), want_a,
                             rtol=5e-2, atol=5e-2))

    # TODO(synk): dropout (p=0.2 / 0.1) is modeled as identity (eval mode).
    print("KERNEL_OK")
</pallas_src>

<mosaic_0001>
module attributes {stable_mosaic.version = 11 : i64} {
  func.func @_add_pe_kernel(%arg0: i32, %arg1: i32, %arg2: memref<1x8x32xbf16, #tpu.memory_space<vmem>>, %arg3: memref<1x8x32xf32, #tpu.memory_space<vmem>>, %arg4: memref<1x8x32xbf16, #tpu.memory_space<vmem>>) attributes {dimension_semantics = [#tpu.dimension_semantics<parallel>, #tpu.dimension_semantics<parallel>], iteration_bounds = array<i64: 2, 1>, scalar_prefetch = 0 : i64, scratch_operands = 0 : i64, tpu.core_type = #tpu.core_type<tc>, window_params = [{transform_indices = @transform_0, window_bounds = array<i64: 1, 8, 32>}, {transform_indices = @transform_1, window_bounds = array<i64: 1, 8, 32>}, {transform_indices = @transform_2, window_bounds = array<i64: 1, 8, 32>}]} {
    %c0 = arith.constant 0 : index
    %c0_0 = arith.constant 0 : index
    %c0_1 = arith.constant 0 : index
    %0 = vector.load %arg2[%c0, %c0_0, %c0_1] : memref<1x8x32xbf16, #tpu.memory_space<vmem>>, vector<1x8x32xbf16>
    %1 = arith.extf %0 : vector<1x8x32xbf16> to vector<1x8x32xf32>
    %c0_2 = arith.constant 0 : index
    %c0_3 = arith.constant 0 : index
    %c0_4 = arith.constant 0 : index
    %2 = vector.load %arg3[%c0_2, %c0_3, %c0_4] : memref<1x8x32xf32, #tpu.memory_space<vmem>>, vector<1x8x32xf32>
    %3 = arith.addf %1, %2 : vector<1x8x32xf32>
    %4 = arith.truncf %3 : vector<1x8x32xf32> to vector<1x8x32xbf16>
    %c0_5 = arith.constant 0 : index
    %c0_6 = arith.constant 0 : index
    %c0_7 = arith.constant 0 : index
    %5 = vector.load %arg4[%c0_5, %c0_6, %c0_7] : memref<1x8x32xbf16, #tpu.memory_space<vmem>>, vector<1x8x32xbf16>
    tpu.vector_store %arg4[%c0_5, %c0_6, %c0_7], %4 {strides = array<i32>} : memref<1x8x32xbf16, #tpu.memory_space<vmem>>, vector<1x8x32xbf16>,
    return
  }
  func.func @transform_0(%arg0: i32, %arg1: i32) -> (i32, i32, i32) {
    %c0_i32 = arith.constant 0 : i32
    %c0_i32_0 = arith.constant 0 : i32
    return %arg0, %arg1, %c0_i32 : i32, i32, i32
  }
  func.func @transform_1(%arg0: i32, %arg1: i32) -> (i32, i32, i32) {
    %c0_i32 = arith.constant 0 : i32
    %c0_i32_0 = arith.constant 0 : i32
    %c0_i32_1 = arith.constant 0 : i32
    return %c0_i32, %arg1, %c0_i32_0 : i32, i32, i32
  }
  func.func @transform_2(%arg0: i32, %arg1: i32) -> (i32, i32, i32) {
    %c0_i32 = arith.constant 0 : i32
    %c0_i32_0 = arith.constant 0 : i32
    return %arg0, %arg1, %c0_i32 : i32, i32, i32
  }
}

module attributes {stable_mosaic.version = 11 : i64} {
  func.func @_mm_bias_kernel_1k(%arg0: i32, %arg1: i32, %arg2: memref<16x32xbf16, #tpu.memory_space<vmem>>, %arg3: memref<32x96xbf16, #tpu.memory_space<vmem>>, %arg4: memref<1x96xf32, #tpu.memory_space<vmem>>, %arg5: memref<16x96xbf16, #tpu.memory_space<vmem>>) attributes {dimension_semantics = [#tpu.dimension_semantics<parallel>, #tpu.dimension_semantics<parallel>], iteration_bounds = array<i64: 1, 1>, scalar_prefetch = 0 : i64, scratch_operands = 0 : i64, tpu.core_type = #tpu.core_type<tc>, window_params = [{transform_indices = @transform_0, window_bounds = array<i64: 16, 32>}, {transform_indices = @transform_1, window_bounds = array<i64: 32, 96>}, {transform_indices = @transform_2, window_bounds = array<i64: 1, 96>}, {transform_indices = @transform_3, window_bounds = array<i64: 16, 96>}]} {
    %c0 = arith.constant 0 : index
    %c0_0 = arith.constant 0 : index
    %0 = vector.load %arg2[%c0, %c0_0] : memref<16x32xbf16, #tpu.memory_space<vmem>>, vector<16x32xbf16>
    %c0_1 = arith.constant 0 : index
    %c0_2 = arith.constant 0 : index
    %1 = vector.load %arg3[%c0_1, %c0_2] : memref<32x96xbf16, #tpu.memory_space<vmem>>, vector<32x96xbf16>
    %cst = arith.constant dense<0.000000e+00> : vector<16x96xf32>
    %2 = tpu.matmul %0, %1, %cst {dimension_numbers = #tpu.dot_dimension_numbers<[1], [0], [0], [1], [0, 0, 1, 1], [], []>} : vector<16x32xbf16>, vector<32x96xbf16>, vector<16x96xf32> -> vector<16x96xf32>
    %c0_3 = arith.constant 0 : index
    %c0_4 = arith.constant 0 : index
    %3 = vector.load %arg4[%c0_3, %c0_4] : memref<1x96xf32, #tpu.memory_space<vmem>>, vector<1x96xf32>
    %4 = vector.broadcast %3 : vector<1x96xf32> to vector<16x96xf32>
    %5 = arith.addf %2, %4 : vector<16x96xf32>
    %6 = arith.truncf %5 : vector<16x96xf32> to vector<16x96xbf16>
    %c0_5 = arith.constant 0 : index
    %c0_6 = arith.constant 0 : index
    %7 = vector.load %arg5[%c0_5, %c0_6] : memref<16x96xbf16, #tpu.memory_space<vmem>>, vector<16x96xbf16>
    tpu.vector_store %arg5[%c0_5, %c0_6], %6 {strides = array<i32>} : memref<16x96xbf16, #tpu.memory_space<vmem>>, vector<16x96xbf16>,
    return
  }
  func.func @transform_0(%arg0: i32, %arg1: i32) -> (i32, i32) {
    %c0_i32 = arith.constant 0 : i32
    %c0_i32_0 = arith.constant 0 : i32
    return %arg0, %c0_i32 : i32, i32
  }
  func.func @transform_1(%arg0: i32, %arg1: i32) -> (i32, i32) {
    %c0_i32 = arith.constant 0 : i32
    %c0_i32_0 = arith.constant 0 : i32
    return %c0_i32, %arg1 : i32, i32
  }
  func.func @transform_2(%arg0: i32, %arg1: i32) -> (i32, i32) {
    %c0_i32 = arith.constant 0 : i32
    %c0_i32_0 = arith.constant 0 : i32
    return %c0_i32, %arg1 : i32, i32
  }
  func.func @transform_3(%arg0: i32, %arg1: i32) -> (i32, i32) {
    %c0_i32 = arith.constant 0 : i32
    return %arg0, %arg1 : i32, i32
  }
}

module attributes {stable_mosaic.version = 11 : i64} {
  func.func @_flash_attn_kernel(%arg0: i32, %arg1: i32, %arg2: i32, %arg3: memref<8x8xf32, #tpu.memory_space<vmem>>, %arg4: memref<1x1x1x8x16xbf16, #tpu.memory_space<vmem>>, %arg5: memref<1x1x1x8x16xbf16, #tpu.memory_space<vmem>>, %arg6: memref<1x1x1x8x16xbf16, #tpu.memory_space<vmem>>, %arg7: memref<1x1x8x16xbf16, #tpu.memory_space<vmem>>, %arg8: memref<8x1xf32, #tpu.memory_space<vmem>>, %arg9: memref<8x1xf32, #tpu.memory_space<vmem>>, %arg10: memref<8x16xf32, #tpu.memory_space<vmem>>) attributes {dimension_semantics = [#tpu.dimension_semantics<parallel>, #tpu.dimension_semantics<parallel>, #tpu.dimension_semantics<arbitrary>], iteration_bounds = array<i64: 2, 2, 1>, scalar_prefetch = 0 : i64, scratch_operands = 3 : i64, tpu.core_type = #tpu.core_type<tc>, window_params = [{transform_indices = @transform_0, window_bounds = array<i64: 8, 8>}, {transform_indices = @transform_1, window_bounds = array<i64: 1, 1, 1, 8, 16>}, {transform_indices = @transform_2, window_bounds = array<i64: 1, 1, 1, 8, 16>}, {transform_indices = @transform_3, window_bounds = array<i64: 1, 1, 1, 8, 16>}, {transform_indices = @transform_4, window_bounds = array<i64: 1, 1, 8, 16>}]} {
    %c0_i32 = arith.constant 0 : i32
    %0 = arith.cmpi eq, %arg2, %c0_i32 : i32
    %1 = arith.extui %0 : i1 to i32
    %c0_i32_0 = arith.constant 0 : i32
    %2 = arith.cmpi ne, %1, %c0_i32_0 : i32
    scf.if %2 {
      %cst_34 = arith.constant 0xFF800000 : f32
      %38 = vector.broadcast %cst_34 : f32 to vector<8x1xf32>
      %c0_35 = arith.constant 0 : index
      %c0_36 = arith.constant 0 : index
      %39 = vector.load %arg8[%c0_35, %c0_36] : memref<8x1xf32, #tpu.memory_space<vmem>>, vector<8x1xf32>
      tpu.vector_store %arg8[%c0_35, %c0_36], %38 {strides = array<i32>} : memref<8x1xf32, #tpu.memory_space<vmem>>, vector<8x1xf32>,
      %cst_37 = arith.constant 0.000000e+00 : f32
      %40 = vector.broadcast %cst_37 : f32 to vector<8x1xf32>
      %c0_38 = arith.constant 0 : index
      %c0_39 = arith.constant 0 : index
      %41 = vector.load %arg9[%c0_38, %c0_39] : memref<8x1xf32, #tpu.memory_space<vmem>>, vector<8x1xf32>
      tpu.vector_store %arg9[%c0_38, %c0_39], %40 {strides = array<i32>} : memref<8x1xf32, #tpu.memory_space<vmem>>, vector<8x1xf32>,
      %cst_40 = arith.constant 0.000000e+00 : f32
      %42 = vector.broadcast %cst_40 : f32 to vector<8x16xf32>
      %c0_41 = arith.constant 0 : index
      %c0_42 = arith.constant 0 : index
      %43 = vector.load %arg10[%c0_41, %c0_42] : memref<8x16xf32, #tpu.memory_space<vmem>>, vector<8x16xf32>
      tpu.vector_store %arg10[%c0_41, %c0_42], %42 {strides = array<i32>} : memref<8x16xf32, #tpu.memory_space<vmem>>, vector<8x16xf32>,
    } else {
    }
    %c0 = arith.constant 0 : index
    %c0_1 = arith.constant 0 : index
    %c0_2 = arith.constant 0 : index
    %c0_3 = arith.constant 0 : index
    %c0_4 = arith.constant 0 : index
    %3 = vector.load %arg4[%c0, %c0_1, %c0_2, %c0_3, %c0_4] : memref<1x1x1x8x16xbf16, #tpu.memory_space<vmem>>, vector<1x1x1x8x16xbf16>
    %4 = vector.shape_cast %3 : vector<1x1x1x8x16xbf16> to vector<8x16xbf16>
    %c0_5 = arith.constant 0 : index
    %c0_6 = arith.constant 0 : index
    %c0_7 = arith.constant 0 : index
    %c0_8 = arith.constant 0 : index
    %c0_9 = arith.constant 0 : index
    %5 = vector.load %arg5[%c0_5, %c0_6, %c0_7, %c0_8, %c0_9] : memref<1x1x1x8x16xbf16, #tpu.memory_space<vmem>>, vector<1x1x1x8x16xbf16>
    %6 = vector.shape_cast %5 : vector<1x1x1x8x16xbf16> to vector<8x16xbf16>
    %c0_10 = arith.constant 0 : index
    %c0_11 = arith.constant 0 : index
    %c0_12 = arith.constant 0 : index
    %c0_13 = arith.constant 0 : index
    %c0_14 = arith.constant 0 : index
    %7 = vector.load %arg6[%c0_10, %c0_11, %c0_12, %c0_13, %c0_14] : memref<1x1x1x8x16xbf16, #tpu.memory_space<vmem>>, vector<1x1x1x8x16xbf16>
    %8 = vector.shape_cast %7 : vector<1x1x1x8x16xbf16> to vector<8x16xbf16>
    %cst = arith.constant dense<0.000000e+00> : vector<8x8xf32>
    %9 = tpu.matmul %4, %6, %cst {dimension_numbers = #tpu.dot_dimension_numbers<[1], [1], [0], [0], [0, 0, 1, 0], [], []>} : vector<8x16xbf16>, vector<8x16xbf16>, vector<8x8xf32> -> vector<8x8xf32>
    %c0_15 = arith.constant 0 : index
    %c0_16 = arith.constant 0 : index
    %10 = vector.load %arg3[%c0_15, %c0_16] : memref<8x8xf32, #tpu.memory_space<vmem>>, vector<8x8xf32>
    %11 = arith.addf %9, %10 : vector<8x8xf32>
    %c0_17 = arith.constant 0 : index
    %c0_18 = arith.constant 0 : index
    %12 = vector.load %arg8[%c0_17, %c0_18] : memref<8x1xf32, #tpu.memory_space<vmem>>, vector<8x1xf32>
    %cst_19 = arith.constant dense<0xFF800000> : vector<8xf32>
    %13 = vector.multi_reduction <maximumf>, %11, %cst_19 [1] : vector<8x8xf32> to vector<8xf32>
    %14 = vector.shape_cast %13 : vector<8xf32> to vector<8x1xf32>
    %15 = arith.maximumf %12, %14 : vector<8x1xf32>
    %16 = arith.subf %12, %15 : vector<8x1xf32>
    %17 = math.exp %16 : vector<8x1xf32>
    %18 = vector.broadcast %15 : vector<8x1xf32> to vector<8x8xf32>
    %19 = arith.subf %11, %18 : vector<8x8xf32>
    %20 = math.exp %19 : vector<8x8xf32>
    %c0_20 = arith.constant 0 : index
    %c0_21 = arith.constant 0 : index
    %21 = vector.load %arg9[%c0_20, %c0_21] : memref<8x1xf32, #tpu.memory_space<vmem>>, vector<8x1xf32>
    %22 = arith.mulf %17, %21 : vector<8x1xf32>
    %cst_22 = arith.constant dense<0.000000e+00> : vector<8xf32>
    %23 = vector.multi_reduction <add>, %20, %cst_22 [1] : vector<8x8xf32> to vector<8xf32>
    %24 = vector.shape_cast %23 : vector<8xf32> to vector<8x1xf32>
    %25 = arith.addf %22, %24 : vector<8x1xf32>
    %c0_23 = arith.constant 0 : index
    %c0_24 = arith.constant 0 : index
    %26 = vector.load %arg9[%c0_23, %c0_24] : memref<8x1xf32, #tpu.memory_space<vmem>>, vector<8x1xf32>
    tpu.vector_store %arg9[%c0_23, %c0_24], %25 {strides = array<i32>} : memref<8x1xf32, #tpu.memory_space<vmem>>, vector<8x1xf32>,
    %c0_25 = arith.constant 0 : index
    %c0_26 = arith.constant 0 : index
    %27 = vector.load %arg10[%c0_25, %c0_26] : memref<8x16xf32, #tpu.memory_space<vmem>>, vector<8x16xf32>
    %28 = vector.broadcast %17 : vector<8x1xf32> to vector<8x16xf32>
    %29 = arith.mulf %28, %27 : vector<8x16xf32>
    %30 = arith.truncf %20 : vector<8x8xf32> to vector<8x8xbf16>
    %cst_27 = arith.constant dense<0.000000e+00> : vector<8x16xf32>
    %31 = tpu.matmul %30, %8, %cst_27 {dimension_numbers = #tpu.dot_dimension_numbers<[1], [0], [0], [1], [0, 0, 1, 1], [], []>} : vector<8x8xbf16>, vector<8x16xbf16>, vector<8x16xf32> -> vector<8x16xf32>
    %32 = arith.addf %29, %31 : vector<8x16xf32>
    %c0_28 = arith.constant 0 : index
    %c0_29 = arith.constant 0 : index
    %33 = vector.load %arg10[%c0_28, %c0_29] : memref<8x16xf32, #tpu.memory_space<vmem>>, vector<8x16xf32>
    tpu.vector_store %arg10[%c0_28, %c0_29], %32 {strides = array<i32>} : memref<8x16xf32, #tpu.memory_space<vmem>>, vector<8x16xf32>,
    %c0_30 = arith.constant 0 : index
    %c0_31 = arith.constant 0 : index
    %34 = vector.load %arg8[%c0_30, %c0_31] : memref<8x1xf32, #tpu.memory_space<vmem>>, vector<8x1xf32>
    tpu.vector_store %arg8[%c0_30, %c0_31], %15 {strides = array<i32>} : memref<8x1xf32, #tpu.memory_space<vmem>>, vector<8x1xf32>,
    %c0_i32_32 = arith.constant 0 : i32
    %35 = arith.cmpi eq, %arg2, %c0_i32_32 : i32
    %36 = arith.extui %35 : i1 to i32
    %c0_i32_33 = arith.constant 0 : i32
    %37 = arith.cmpi ne, %36, %c0_i32_33 : i32
    scf.if %37 {
      %c0_34 = arith.constant 0 : index
      %c0_35 = arith.constant 0 : index
      %38 = vector.load %arg10[%c0_34, %c0_35] : memref<8x16xf32, #tpu.memory_space<vmem>>, vector<8x16xf32>
      %c0_36 = arith.constant 0 : index
      %c0_37 = arith.constant 0 : index
      %39 = vector.load %arg9[%c0_36, %c0_37] : memref<8x1xf32, #tpu.memory_space<vmem>>, vector<8x1xf32>
      %40 = vector.broadcast %39 : vector<8x1xf32> to vector<8x16xf32>
      %41 = arith.divf %38, %40 : vector<8x16xf32>
      %42 = arith.truncf %41 : vector<8x16xf32> to vector<8x16xbf16>
      %c0_38 = arith.constant 0 : index
      %c0_39 = arith.constant 0 : index
      %c0_40 = arith.constant 0 : index
      %c0_41 = arith.constant 0 : index
      %43 = vector.load %arg7[%c0_38, %c0_39, %c0_40, %c0_41] : memref<1x1x8x16xbf16, #tpu.memory_space<vmem>>, vector<1x1x8x16xbf16>
      %44 = vector.shape_cast %43 : vector<1x1x8x16xbf16> to vector<8x16xbf16>
      %45 = vector.shape_cast %42 : vector<8x16xbf16> to vector<1x1x8x16xbf16>
      tpu.vector_store %arg7[%c0_38, %c0_39, %c0_40, %c0_41], %45 {strides = array<i32>} : memref<1x1x8x16xbf16, #tpu.memory_space<vmem>>, vector<1x1x8x16xbf16>,
    } else {
    }
    return
  }
  func.func @transform_0(%arg0: i32, %arg1: i32, %arg2: i32) -> (i32, i32) {
    %c0_i32 = arith.constant 0 : i32
    %c0_i32_0 = arith.constant 0 : i32
    return %c0_i32, %arg2 : i32, i32
  }
  func.func @transform_1(%arg0: i32, %arg1: i32, %arg2: i32) -> (i32, i32, i32, i32, i32) {
    %c0_i32 = arith.constant 0 : i32
    %c0_i32_0 = arith.constant 0 : i32
    %c0_i32_1 = arith.constant 0 : i32
    %c0_i32_2 = arith.constant 0 : i32
    return %c0_i32, %arg0, %arg1, %c0_i32_0, %c0_i32_1 : i32, i32, i32, i32, i32
  }
  func.func @transform_2(%arg0: i32, %arg1: i32, %arg2: i32) -> (i32, i32, i32, i32, i32) {
    %c1_i32 = arith.constant 1 : i32
    %c0_i32 = arith.constant 0 : i32
    %c0_i32_0 = arith.constant 0 : i32
    return %c1_i32, %arg0, %arg1, %arg2, %c0_i32 : i32, i32, i32, i32, i32
  }
  func.func @transform_3(%arg0: i32, %arg1: i32, %arg2: i32) -> (i32, i32, i32, i32, i32) {
    %c2_i32 = arith.constant 2 : i32
    %c0_i32 = arith.constant 0 : i32
    %c0_i32_0 = arith.constant 0 : i32
    return %c2_i32, %arg0, %arg1, %arg2, %c0_i32 : i32, i32, i32, i32, i32
  }
  func.func @transform_4(%arg0: i32, %arg1: i32, %arg2: i32) -> (i32, i32, i32, i32) {
    %c0_i32 = arith.constant 0 : i32
    %c0_i32_0 = arith.constant 0 : i32
    %c0_i32_1 = arith.constant 0 : i32
    return %arg0, %arg1, %c0_i32, %c0_i32_0 : i32, i32, i32, i32
  }
}

module attributes {stable_mosaic.version = 11 : i64} {
  func.func @_mm_bias_ln_kernel_1k(%arg0: i32, %arg1: i32, %arg2: memref<16x32xbf16, #tpu.memory_space<vmem>>, %arg3: memref<32x32xbf16, #tpu.memory_space<vmem>>, %arg4: memref<1x32xf32, #tpu.memory_space<vmem>>, %arg5: memref<16x32xbf16, #tpu.memory_space<vmem>>, %arg6: memref<1x32xf32, #tpu.memory_space<vmem>>, %arg7: memref<1x32xf32, #tpu.memory_space<vmem>>, %arg8: memref<16x32xbf16, #tpu.memory_space<vmem>>) attributes {dimension_semantics = [#tpu.dimension_semantics<parallel>, #tpu.dimension_semantics<parallel>], iteration_bounds = array<i64: 1, 1>, scalar_prefetch = 0 : i64, scratch_operands = 0 : i64, tpu.core_type = #tpu.core_type<tc>, window_params = [{transform_indices = @transform_0, window_bounds = array<i64: 16, 32>}, {transform_indices = @transform_1, window_bounds = array<i64: 32, 32>}, {transform_indices = @transform_2, window_bounds = array<i64: 1, 32>}, {transform_indices = @transform_3, window_bounds = array<i64: 16, 32>}, {transform_indices = @transform_4, window_bounds = array<i64: 1, 32>}, {transform_indices = @transform_5, window_bounds = array<i64: 1, 32>}, {transform_indices = @transform_6, window_bounds = array<i64: 16, 32>}]} {
    %c0 = arith.constant 0 : index
    %c0_0 = arith.constant 0 : index
    %0 = vector.load %arg2[%c0, %c0_0] : memref<16x32xbf16, #tpu.memory_space<vmem>>, vector<16x32xbf16>
    %c0_1 = arith.constant 0 : index
    %c0_2 = arith.constant 0 : index
    %1 = vector.load %arg3[%c0_1, %c0_2] : memref<32x32xbf16, #tpu.memory_space<vmem>>, vector<32x32xbf16>
    %cst = arith.constant dense<0.000000e+00> : vector<16x32xf32>
    %2 = tpu.matmul %0, %1, %cst {dimension_numbers = #tpu.dot_dimension_numbers<[1], [0], [0], [1], [0, 0, 1, 1], [], []>} : vector<16x32xbf16>, vector<32x32xbf16>, vector<16x32xf32> -> vector<16x32xf32>
    %c0_3 = arith.constant 0 : index
    %c0_4 = arith.constant 0 : index
    %3 = vector.load %arg4[%c0_3, %c0_4] : memref<1x32xf32, #tpu.memory_space<vmem>>, vector<1x32xf32>
    %4 = vector.broadcast %3 : vector<1x32xf32> to vector<16x32xf32>
    %5 = arith.addf %2, %4 : vector<16x32xf32>
    %c0_5 = arith.constant 0 : index
    %c0_6 = arith.constant 0 : index
    %6 = vector.load %arg5[%c0_5, %c0_6] : memref<16x32xbf16, #tpu.memory_space<vmem>>, vector<16x32xbf16>
    %7 = arith.extf %6 : vector<16x32xbf16> to vector<16x32xf32>
    %8 = arith.addf %5, %7 : vector<16x32xf32>
    %cst_7 = arith.constant dense<0.000000e+00> : vector<16xf32>
    %9 = vector.multi_reduction <add>, %8, %cst_7 [1] : vector<16x32xf32> to vector<16xf32>
    %10 = vector.shape_cast %9 : vector<16xf32> to vector<16x1xf32>
    %cst_8 = arith.constant 3.200000e+01 : f32
    %11 = vector.broadcast %cst_8 : f32 to vector<16x1xf32>
    %12 = arith.divf %10, %11 : vector<16x1xf32>
    %13 = vector.broadcast %12 : vector<16x1xf32> to vector<16x32xf32>
    %14 = arith.subf %8, %13 : vector<16x32xf32>
    %15 = arith.mulf %14, %14 : vector<16x32xf32>
    %cst_9 = arith.constant dense<0.000000e+00> : vector<16xf32>
    %16 = vector.multi_reduction <add>, %15, %cst_9 [1] : vector<16x32xf32> to vector<16xf32>
    %17 = vector.shape_cast %16 : vector<16xf32> to vector<16x1xf32>
    %cst_10 = arith.constant 3.200000e+01 : f32
    %18 = vector.broadcast %cst_10 : f32 to vector<16x1xf32>
    %19 = arith.divf %17, %18 : vector<16x1xf32>
    %20 = vector.broadcast %12 : vector<16x1xf32> to vector<16x32xf32>
    %21 = arith.subf %8, %20 : vector<16x32xf32>
    %cst_11 = arith.constant 9.99999974E-6 : f32
    %22 = vector.broadcast %cst_11 : f32 to vector<16x1xf32>
    %23 = arith.addf %19, %22 : vector<16x1xf32>
    %24 = math.rsqrt %23 : vector<16x1xf32>
    %25 = vector.broadcast %24 : vector<16x1xf32> to vector<16x32xf32>
    %26 = arith.mulf %21, %25 : vector<16x32xf32>
    %c0_12 = arith.constant 0 : index
    %c0_13 = arith.constant 0 : index
    %27 = vector.load %arg6[%c0_12, %c0_13] : memref<1x32xf32, #tpu.memory_space<vmem>>, vector<1x32xf32>
    %28 = vector.broadcast %27 : vector<1x32xf32> to vector<16x32xf32>
    %29 = arith.mulf %26, %28 : vector<16x32xf32>
    %c0_14 = arith.constant 0 : index
    %c0_15 = arith.constant 0 : index
    %30 = vector.load %arg7[%c0_14, %c0_15] : memref<1x32xf32, #tpu.memory_space<vmem>>, vector<1x32xf32>
    %31 = vector.broadcast %30 : vector<1x32xf32> to vector<16x32xf32>
    %32 = arith.addf %29, %31 : vector<16x32xf32>
    %33 = arith.truncf %32 : vector<16x32xf32> to vector<16x32xbf16>
    %c0_16 = arith.constant 0 : index
    %c0_17 = arith.constant 0 : index
    %34 = vector.load %arg8[%c0_16, %c0_17] : memref<16x32xbf16, #tpu.memory_space<vmem>>, vector<16x32xbf16>
    tpu.vector_store %arg8[%c0_16, %c0_17], %33 {strides = array<i32>} : memref<16x32xbf16, #tpu.memory_space<vmem>>, vector<16x32xbf16>,
    return
  }
  func.func @transform_0(%arg0: i32, %arg1: i32) -> (i32, i32) {
    %c0_i32 = arith.constant 0 : i32
    %c0_i32_0 = arith.constant 0 : i32
    return %arg0, %c0_i32 : i32, i32
  }
  func.func @transform_1(%arg0: i32, %arg1: i32) -> (i32, i32) {
    %c0_i32 = arith.constant 0 : i32
    %c0_i32_0 = arith.constant 0 : i32
    return %c0_i32, %arg1 : i32, i32
  }
  func.func @transform_2(%arg0: i32, %arg1: i32) -> (i32, i32) {
    %c0_i32 = arith.constant 0 : i32
    %c0_i32_0 = arith.constant 0 : i32
    return %c0_i32, %arg1 : i32, i32
  }
  func.func @transform_3(%arg0: i32, %arg1: i32) -> (i32, i32) {
    %c0_i32 = arith.constant 0 : i32
    return %arg0, %arg1 : i32, i32
  }
  func.func @transform_4(%arg0: i32, %arg1: i32) -> (i32, i32) {
    %c0_i32 = arith.constant 0 : i32
    %c0_i32_0 = arith.constant 0 : i32
    return %c0_i32, %arg1 : i32, i32
  }
  func.func @transform_5(%arg0: i32, %arg1: i32) -> (i32, i32) {
    %c0_i32 = arith.constant 0 : i32
    %c0_i32_0 = arith.constant 0 : i32
    return %c0_i32, %arg1 : i32, i32
  }
  func.func @transform_6(%arg0: i32, %arg1: i32) -> (i32, i32) {
    %c0_i32 = arith.constant 0 : i32
    return %arg0, %arg1 : i32, i32
  }
}

module attributes {stable_mosaic.version = 11 : i64} {
  func.func @_mm_bias_kernel_1k(%arg0: i32, %arg1: i32, %arg2: memref<16x32xbf16, #tpu.memory_space<vmem>>, %arg3: memref<32x64xbf16, #tpu.memory_space<vmem>>, %arg4: memref<1x64xf32, #tpu.memory_space<vmem>>, %arg5: memref<16x64xbf16, #tpu.memory_space<vmem>>) attributes {dimension_semantics = [#tpu.dimension_semantics<parallel>, #tpu.dimension_semantics<parallel>], iteration_bounds = array<i64: 1, 1>, scalar_prefetch = 0 : i64, scratch_operands = 0 : i64, tpu.core_type = #tpu.core_type<tc>, window_params = [{transform_indices = @transform_0, window_bounds = array<i64: 16, 32>}, {transform_indices = @transform_1, window_bounds = array<i64: 32, 64>}, {transform_indices = @transform_2, window_bounds = array<i64: 1, 64>}, {transform_indices = @transform_3, window_bounds = array<i64: 16, 64>}]} {
    %c0 = arith.constant 0 : index
    %c0_0 = arith.constant 0 : index
    %0 = vector.load %arg2[%c0, %c0_0] : memref<16x32xbf16, #tpu.memory_space<vmem>>, vector<16x32xbf16>
    %c0_1 = arith.constant 0 : index
    %c0_2 = arith.constant 0 : index
    %1 = vector.load %arg3[%c0_1, %c0_2] : memref<32x64xbf16, #tpu.memory_space<vmem>>, vector<32x64xbf16>
    %cst = arith.constant dense<0.000000e+00> : vector<16x64xf32>
    %2 = tpu.matmul %0, %1, %cst {dimension_numbers = #tpu.dot_dimension_numbers<[1], [0], [0], [1], [0, 0, 1, 1], [], []>} : vector<16x32xbf16>, vector<32x64xbf16>, vector<16x64xf32> -> vector<16x64xf32>
    %c0_3 = arith.constant 0 : index
    %c0_4 = arith.constant 0 : index
    %3 = vector.load %arg4[%c0_3, %c0_4] : memref<1x64xf32, #tpu.memory_space<vmem>>, vector<1x64xf32>
    %4 = vector.broadcast %3 : vector<1x64xf32> to vector<16x64xf32>
    %5 = arith.addf %2, %4 : vector<16x64xf32>
    %cst_5 = arith.constant 0.000000e+00 : f32
    %6 = vector.broadcast %cst_5 : f32 to vector<16x64xf32>
    %7 = arith.maximumf %5, %6 : vector<16x64xf32>
    %8 = arith.truncf %7 : vector<16x64xf32> to vector<16x64xbf16>
    %c0_6 = arith.constant 0 : index
    %c0_7 = arith.constant 0 : index
    %9 = vector.load %arg5[%c0_6, %c0_7] : memref<16x64xbf16, #tpu.memory_space<vmem>>, vector<16x64xbf16>
    tpu.vector_store %arg5[%c0_6, %c0_7], %8 {strides = array<i32>} : memref<16x64xbf16, #tpu.memory_space<vmem>>, vector<16x64xbf16>,
    return
  }
  func.func @transform_0(%arg0: i32, %arg1: i32) -> (i32, i32) {
    %c0_i32 = arith.constant 0 : i32
    %c0_i32_0 = arith.constant 0 : i32
    return %arg0, %c0_i32 : i32, i32
  }
  func.func @transform_1(%arg0: i32, %arg1: i32) -> (i32, i32) {
    %c0_i32 = arith.constant 0 : i32
    %c0_i32_0 = arith.constant 0 : i32
    return %c0_i32, %arg1 : i32, i32
  }
  func.func @transform_2(%arg0: i32, %arg1: i32) -> (i32, i32) {
    %c0_i32 = arith.constant 0 : i32
    %c0_i32_0 = arith.constant 0 : i32
    return %c0_i32, %arg1 : i32, i32
  }
  func.func @transform_3(%arg0: i32, %arg1: i32) -> (i32, i32) {
    %c0_i32 = arith.constant 0 : i32
    return %arg0, %arg1 : i32, i32
  }
}

module attributes {stable_mosaic.version = 11 : i64} {
  func.func @_mm_bias_ln_kernel_1k(%arg0: i32, %arg1: i32, %arg2: memref<16x64xbf16, #tpu.memory_space<vmem>>, %arg3: memref<64x32xbf16, #tpu.memory_space<vmem>>, %arg4: memref<1x32xf32, #tpu.memory_space<vmem>>, %arg5: memref<16x32xbf16, #tpu.memory_space<vmem>>, %arg6: memref<1x32xf32, #tpu.memory_space<vmem>>, %arg7: memref<1x32xf32, #tpu.memory_space<vmem>>, %arg8: memref<16x32xbf16, #tpu.memory_space<vmem>>) attributes {dimension_semantics = [#tpu.dimension_semantics<parallel>, #tpu.dimension_semantics<parallel>], iteration_bounds = array<i64: 1, 1>, scalar_prefetch = 0 : i64, scratch_operands = 0 : i64, tpu.core_type = #tpu.core_type<tc>, window_params = [{transform_indices = @transform_0, window_bounds = array<i64: 16, 64>}, {transform_indices = @transform_1, window_bounds = array<i64: 64, 32>}, {transform_indices = @transform_2, window_bounds = array<i64: 1, 32>}, {transform_indices = @transform_3, window_bounds = array<i64: 16, 32>}, {transform_indices = @transform_4, window_bounds = array<i64: 1, 32>}, {transform_indices = @transform_5, window_bounds = array<i64: 1, 32>}, {transform_indices = @transform_6, window_bounds = array<i64: 16, 32>}]} {
    %c0 = arith.constant 0 : index
    %c0_0 = arith.constant 0 : index
    %0 = vector.load %arg2[%c0, %c0_0] : memref<16x64xbf16, #tpu.memory_space<vmem>>, vector<16x64xbf16>
    %c0_1 = arith.constant 0 : index
    %c0_2 = arith.constant 0 : index
    %1 = vector.load %arg3[%c0_1, %c0_2] : memref<64x32xbf16, #tpu.memory_space<vmem>>, vector<64x32xbf16>
    %cst = arith.constant dense<0.000000e+00> : vector<16x32xf32>
    %2 = tpu.matmul %0, %1, %cst {dimension_numbers = #tpu.dot_dimension_numbers<[1], [0], [0], [1], [0, 0, 1, 1], [], []>} : vector<16x64xbf16>, vector<64x32xbf16>, vector<16x32xf32> -> vector<16x32xf32>
    %c0_3 = arith.constant 0 : index
    %c0_4 = arith.constant 0 : index
    %3 = vector.load %arg4[%c0_3, %c0_4] : memref<1x32xf32, #tpu.memory_space<vmem>>, vector<1x32xf32>
    %4 = vector.broadcast %3 : vector<1x32xf32> to vector<16x32xf32>
    %5 = arith.addf %2, %4 : vector<16x32xf32>
    %c0_5 = arith.constant 0 : index
    %c0_6 = arith.constant 0 : index
    %6 = vector.load %arg5[%c0_5, %c0_6] : memref<16x32xbf16, #tpu.memory_space<vmem>>, vector<16x32xbf16>
    %7 = arith.extf %6 : vector<16x32xbf16> to vector<16x32xf32>
    %8 = arith.addf %5, %7 : vector<16x32xf32>
    %cst_7 = arith.constant dense<0.000000e+00> : vector<16xf32>
    %9 = vector.multi_reduction <add>, %8, %cst_7 [1] : vector<16x32xf32> to vector<16xf32>
    %10 = vector.shape_cast %9 : vector<16xf32> to vector<16x1xf32>
    %cst_8 = arith.constant 3.200000e+01 : f32
    %11 = vector.broadcast %cst_8 : f32 to vector<16x1xf32>
    %12 = arith.divf %10, %11 : vector<16x1xf32>
    %13 = vector.broadcast %12 : vector<16x1xf32> to vector<16x32xf32>
    %14 = arith.subf %8, %13 : vector<16x32xf32>
    %15 = arith.mulf %14, %14 : vector<16x32xf32>
    %cst_9 = arith.constant dense<0.000000e+00> : vector<16xf32>
    %16 = vector.multi_reduction <add>, %15, %cst_9 [1] : vector<16x32xf32> to vector<16xf32>
    %17 = vector.shape_cast %16 : vector<16xf32> to vector<16x1xf32>
    %cst_10 = arith.constant 3.200000e+01 : f32
    %18 = vector.broadcast %cst_10 : f32 to vector<16x1xf32>
    %19 = arith.divf %17, %18 : vector<16x1xf32>
    %20 = vector.broadcast %12 : vector<16x1xf32> to vector<16x32xf32>
    %21 = arith.subf %8, %20 : vector<16x32xf32>
    %cst_11 = arith.constant 9.99999974E-6 : f32
    %22 = vector.broadcast %cst_11 : f32 to vector<16x1xf32>
    %23 = arith.addf %19, %22 : vector<16x1xf32>
    %24 = math.rsqrt %23 : vector<16x1xf32>
    %25 = vector.broadcast %24 : vector<16x1xf32> to vector<16x32xf32>
    %26 = arith.mulf %21, %25 : vector<16x32xf32>
    %c0_12 = arith.constant 0 : index
    %c0_13 = arith.constant 0 : index
    %27 = vector.load %arg6[%c0_12, %c0_13] : memref<1x32xf32, #tpu.memory_space<vmem>>, vector<1x32xf32>
    %28 = vector.broadcast %27 : vector<1x32xf32> to vector<16x32xf32>
    %29 = arith.mulf %26, %28 : vector<16x32xf32>
    %c0_14 = arith.constant 0 : index
    %c0_15 = arith.constant 0 : index
    %30 = vector.load %arg7[%c0_14, %c0_15] : memref<1x32xf32, #tpu.memory_space<vmem>>, vector<1x32xf32>
    %31 = vector.broadcast %30 : vector<1x32xf32> to vector<16x32xf32>
    %32 = arith.addf %29, %31 : vector<16x32xf32>
    %33 = arith.truncf %32 : vector<16x32xf32> to vector<16x32xbf16>
    %c0_16 = arith.constant 0 : index
    %c0_17 = arith.constant 0 : index
    %34 = vector.load %arg8[%c0_16, %c0_17] : memref<16x32xbf16, #tpu.memory_space<vmem>>, vector<16x32xbf16>
    tpu.vector_store %arg8[%c0_16, %c0_17], %33 {strides = array<i32>} : memref<16x32xbf16, #tpu.memory_space<vmem>>, vector<16x32xbf16>,
    return
  }
  func.func @transform_0(%arg0: i32, %arg1: i32) -> (i32, i32) {
    %c0_i32 = arith.constant 0 : i32
    %c0_i32_0 = arith.constant 0 : i32
    return %arg0, %c0_i32 : i32, i32
  }
  func.func @transform_1(%arg0: i32, %arg1: i32) -> (i32, i32) {
    %c0_i32 = arith.constant 0 : i32
    %c0_i32_0 = arith.constant 0 : i32
    return %c0_i32, %arg1 : i32, i32
  }
  func.func @transform_2(%arg0: i32, %arg1: i32) -> (i32, i32) {
    %c0_i32 = arith.constant 0 : i32
    %c0_i32_0 = arith.constant 0 : i32
    return %c0_i32, %arg1 : i32, i32
  }
  func.func @transform_3(%arg0: i32, %arg1: i32) -> (i32, i32) {
    %c0_i32 = arith.constant 0 : i32
    return %arg0, %arg1 : i32, i32
  }
  func.func @transform_4(%arg0: i32, %arg1: i32) -> (i32, i32) {
    %c0_i32 = arith.constant 0 : i32
    %c0_i32_0 = arith.constant 0 : i32
    return %c0_i32, %arg1 : i32, i32
  }
  func.func @transform_5(%arg0: i32, %arg1: i32) -> (i32, i32) {
    %c0_i32 = arith.constant 0 : i32
    %c0_i32_0 = arith.constant 0 : i32
    return %c0_i32, %arg1 : i32, i32
  }
  func.func @transform_6(%arg0: i32, %arg1: i32) -> (i32, i32) {
    %c0_i32 = arith.constant 0 : i32
    return %arg0, %arg1 : i32, i32
  }
}

module attributes {stable_mosaic.version = 11 : i64} {
  func.func @_mm_bias_kernel_1k(%arg0: i32, %arg1: i32, %arg2: memref<16x32xbf16, #tpu.memory_space<vmem>>, %arg3: memref<32x64xbf16, #tpu.memory_space<vmem>>, %arg4: memref<1x64xf32, #tpu.memory_space<vmem>>, %arg5: memref<16x64xf32, #tpu.memory_space<vmem>>) attributes {dimension_semantics = [#tpu.dimension_semantics<parallel>, #tpu.dimension_semantics<parallel>], iteration_bounds = array<i64: 1, 1>, scalar_prefetch = 0 : i64, scratch_operands = 0 : i64, tpu.core_type = #tpu.core_type<tc>, window_params = [{transform_indices = @transform_0, window_bounds = array<i64: 16, 32>}, {transform_indices = @transform_1, window_bounds = array<i64: 32, 64>}, {transform_indices = @transform_2, window_bounds = array<i64: 1, 64>}, {transform_indices = @transform_3, window_bounds = array<i64: 16, 64>}]} {
    %c0 = arith.constant 0 : index
    %c0_0 = arith.constant 0 : index
    %0 = vector.load %arg2[%c0, %c0_0] : memref<16x32xbf16, #tpu.memory_space<vmem>>, vector<16x32xbf16>
    %c0_1 = arith.constant 0 : index
    %c0_2 = arith.constant 0 : index
    %1 = vector.load %arg3[%c0_1, %c0_2] : memref<32x64xbf16, #tpu.memory_space<vmem>>, vector<32x64xbf16>
    %cst = arith.constant dense<0.000000e+00> : vector<16x64xf32>
    %2 = tpu.matmul %0, %1, %cst {dimension_numbers = #tpu.dot_dimension_numbers<[1], [0], [0], [1], [0, 0, 1, 1], [], []>} : vector<16x32xbf16>, vector<32x64xbf16>, vector<16x64xf32> -> vector<16x64xf32>
    %c0_3 = arith.constant 0 : index
    %c0_4 = arith.constant 0 : index
    %3 = vector.load %arg4[%c0_3, %c0_4] : memref<1x64xf32, #tpu.memory_space<vmem>>, vector<1x64xf32>
    %4 = vector.broadcast %3 : vector<1x64xf32> to vector<16x64xf32>
    %5 = arith.addf %2, %4 : vector<16x64xf32>
    %c0_5 = arith.constant 0 : index
    %c0_6 = arith.constant 0 : index
    %6 = vector.load %arg5[%c0_5, %c0_6] : memref<16x64xf32, #tpu.memory_space<vmem>>, vector<16x64xf32>
    tpu.vector_store %arg5[%c0_5, %c0_6], %5 {strides = array<i32>} : memref<16x64xf32, #tpu.memory_space<vmem>>, vector<16x64xf32>,
    return
  }
  func.func @transform_0(%arg0: i32, %arg1: i32) -> (i32, i32) {
    %c0_i32 = arith.constant 0 : i32
    %c0_i32_0 = arith.constant 0 : i32
    return %arg0, %c0_i32 : i32, i32
  }
  func.func @transform_1(%arg0: i32, %arg1: i32) -> (i32, i32) {
    %c0_i32 = arith.constant 0 : i32
    %c0_i32_0 = arith.constant 0 : i32
    return %c0_i32, %arg1 : i32, i32
  }
  func.func @transform_2(%arg0: i32, %arg1: i32) -> (i32, i32) {
    %c0_i32 = arith.constant 0 : i32
    %c0_i32_0 = arith.constant 0 : i32
    return %c0_i32, %arg1 : i32, i32
  }
  func.func @transform_3(%arg0: i32, %arg1: i32) -> (i32, i32) {
    %c0_i32 = arith.constant 0 : i32
    return %arg0, %arg1 : i32, i32
  }
}

</mosaic_0001>

<bundles_post_ra>
// kernel: transformer_forward.12
= control target key start
LH: loop header
LB: loop body
LE: loop exit
PB: predicated region body
PF: predicated region fallthrough
CT: control target
= control target key end

     0   :  { %s357_s9 = smov 0   ;;  %s359_s10 = smov 0   ;;  %s381_s0 = inlined_call_operand.vmem [shape: bf16[2,8,32], index: 0, kind: input, shape index: {}]   ;;  %s382_s1 = inlined_call_operand.vmem [shape: f32[1,8,32], index: 1, kind: input, shape index: {}]   ;;  %s383_s2 = inlined_call_operand.vmem [shape: bf16[2,8,32], index: 2, kind: output, shape index: {}]  }
   0x1   :  { %s361_s11 = smov 0  }
   0x2 LB: > { %s24_s12 = sadd.s32 1, %s336_s10  ;;  %p289_p0 = scmp.ge.s32.totalorder %s340_s11, 1  ;;  %s340_s11 = sphi %s361_s11, %s12_s11   ;;  %s336_s10 = sphi %s359_s10, %s385_s10   ;;  %s332_s9 = sphi %s357_s9, %s384_s9  }
   0x3   : > { %p26_p1 = scmp.ge.s32.totalorder %s24_s12, 2  ;;  %p139_p2 = scmp.lt.s32.totalorder %s340_s11, 3 }
   0x5   : > { %s387_s12 = smov (%p26_p1, %s24_s12), 0  ;;  %p140_p3 = pnand %p289_p0, %p139_p2 }
   0x6   : > { %p169_p4 = scmp.lt.s32.totalorder (!%p140_p3), %s332_s9, 1 }
   0x7   : > { %143 = sbr.rel (%p140_p3) target bundleno = 23 (0x17), region = 28 }
   0xc   : > { %s389_s9 = smov (!%p169_p4, %s332_s9), 1  ;;  %v189_v1 = vld [vmem:[%s382_s1] sm:$0xff]  ;;  %vm192_vm0 = vcmask 257024  }
   0xd   : > { %s290_s13 = sshll.u32 %s389_s9, 2 }
   0xe   : > { %s175_s16 = scalar_lea.vmem %s381_s0, %s290_s13  ;;  %s186_s21 = scalar_lea.vmem %s383_s2, %s290_s13 }
   0xf   : > { %v187_v0 = vld [vmem:[%s175_s16] sm:$0xf] }
  0x10   : > { %v188_v2 = vunpack.c.l.bf16 %v187_v0 }
  0x12   : > { %v190_v3 = vadd.f32 %v189_v1, %v188_v2 }
  0x14   : > { %v191_v4 = vpack.c.bf16 %v190_v3, %v190_v3 }
  0x16   : > { %193 = vst.msk [vmem:[%s186_s21] sm:$0xf] %vm192_vm0, %v191_v4 }
  0x17 PF: > { %s12_s11 = sadd.s32 1, %s340_s11   ;;  %s384_s9 = smov %s336_s10 }
  0x18   : > { %p9_p5 = scmp.ge.s32.totalorder %s12_s11, 4   ;;  %s385_s10 = smov %s387_s12 }
  0x1a   :  { %11 = sbr.rel (!%p9_p5) target bundleno = 2 (0x2), region = 61 }

// kernel: transformer_forward.13
= control target key start
LH: loop header
LB: loop body
LE: loop exit
PB: predicated region body
PF: predicated region fallthrough
CT: control target
= control target key end

     0   :  { %v130_v0 = vmov 0.0   ;;  %vm131_vm0 = vmmov 0   ;;  %vm45_vm1 = vcmask 261120   ;;  %vm98_vm2 = vcmask 781312   ;;  %s170_s1 = inlined_call_operand.vmem [shape: bf16[32,96], index: 1, kind: input, shape index: {}]   ;;  %s171_s0 = inlined_call_operand.vmem [shape: bf16[16,32], index: 0, kind: input, shape index: {}]   ;;  %s172_s2 = inlined_call_operand.vmem [shape: f32[1,96], index: 2, kind: input, shape index: {}]   ;;  %s173_s3 = inlined_call_operand.vmem [shape: bf16[16,96], index: 3, kind: output, shape index: {}]  }
   0x1   :  { %117 = vmatprep.subr.bf16.mxu0 %v130_v0  ;;  %v127_v1 = vld [vmem:[%s170_s1 + $0x8] sm:$0xff]   ;;  %121 = vmatprep.mubr.msk.bf16.mxu0 %vm131_vm0, %v130_v0  ;;  %v128_v2 = vld [vmem:[%s170_s1] sm:$0xff]  }
   0x2   :  { %118 = vmatpush3.bf16.msra.mxu0 %v127_v1  ;;  %v129_v3 = vld [vmem:[%s171_s0] sm:$0xff]  }
   0x3   :  { %119 = vmatprep.subr.bf16.mxu0 %v130_v0  ;;  %v105_v4 = vld [vmem:[%s172_s2] ss:$0 sm:$0xff] }
   0x6   :  { %120 = vmatpush3.bf16.msra.mxu0 %v128_v2 }
   0x9   :  { %122 = vmatmul.mubr.msk.bf16.vlgmr.msra.gmra.mxu0 %vm45_vm1, %v129_v3 }
  0xc9   :  { %v83_v5 = vpop.f32.mrf.mxu0 }
  0xca   :  { %v84_v6 = vadd.f32 %v105_v4, %v83_v5 }
  0xcb   :  { %v123_v7 = vpop.f32.mrf.mxu0 }
  0xcc   :  { %v112_v8 = vpack.c.bf16 %v84_v6, %v84_v6 }
  0xcd   :  { %v86_v9 = vpop.f32.mrf.mxu0 }
  0xce   :  { %99 = vst.msk [vmem:[%s173_s3] sm:$0xf] %vm98_vm2, %v112_v8  ;;  %v87_v10 = vadd.f32 %v105_v4, %v86_v9 }
  0xcf   :  { %v124_v11 = vpop.f32.mrf.mxu0 }
  0xd0   :  { %v113_v12 = vpack.c.bf16 %v87_v10, %v87_v10 }
  0xd2   :  { %100 = vst.msk [vmem:[%s173_s3 + $0x4] sm:$0xf] %vm98_vm2, %v113_v12 }

// kernel: transformer_forward.14
= control target key start
LH: loop header
LB: loop body
LE: loop exit
PB: predicated region body
PF: predicated region fallthrough
CT: control target
= control target key end

     0   :  { %s812_s15 = smov 0   ;;  %s814_s16 = smov 0   ;;  %s889_s0 = inlined_call_operand.vmem [shape: f32[8,8], index: 0, kind: input, shape index: {}]   ;;  %s890_s1 = inlined_call_operand.vmem [shape: bf16[3,2,2,8,16], index: 1, kind: input, shape index: {}, may-alias: {1,2,3}]   ;;  %s891_s2 = inlined_call_operand.vmem [shape: bf16[3,2,2,8,16], index: 2, kind: input, shape index: {}, may-alias: {1,2,3}]   ;;  %s892_s3 = inlined_call_operand.vmem [shape: bf16[3,2,2,8,16], index: 3, kind: input, shape index: {}, may-alias: {1,2,3}]   ;;  %s893_s4 = inlined_call_operand.vmem [shape: bf16[2,2,8,16], index: 4, kind: output, shape index: {}]  }
   0x1   :  { %s816_s17 = smov 0   ;;  %s818_s18 = smov 0  }
   0x2   :  { %s820_s19 = smov 0  }
   0x3 LB: > { %s29_s20 = sadd.s32 1, %s773_s17  ;;  %s33_s21 = sadd.s32 1, %s777_s18  ;;  %s781_s19 = sphi %s820_s19, %s14_s19   ;;  %s777_s18 = sphi %s818_s18, %s897_s18   ;;  %s773_s17 = sphi %s816_s17, %s896_s17   ;;  %s769_s16 = sphi %s814_s16, %s895_s16   ;;  %s765_s15 = sphi %s812_s15, %s894_s15  }
   0x4   : > { %p31_p0 = scmp.ge.s32.totalorder %s29_s20, 2  ;;  %p660_p1 = scmp.ge.s32.totalorder %s781_s19, 1 }
   0x5   : > { %p239_p2 = scmp.lt.s32.totalorder %s781_s19, 5 }
   0x6   : > { %s899_s20 = smov (%p31_p0, %s29_s20), 0  ;;  %s901_s21 = smov (!%p31_p0, %s33_s21), %s777_s18 }
   0x7   : > { %p240_p3 = pnand %p660_p1, %p239_p2  ;;  %p35_p4 = scmp.ge.s32.totalorder %s901_s21, 2 }
   0x8   : > { %p303_p5 = scmp.lt.s32.totalorder (!%p240_p3), %s769_s16, 1  ;;  %p305_p6 = scmp.lt.s32.totalorder (!%p240_p3), %s765_s15, 1 }
   0x9   : > { %s903_s21 = smov (%p35_p4, %s901_s21), 0  ;;  %243 = sbr.rel (%p240_p3) target bundleno = 800 (0x320), region = 36 }
   0xe   : > { %vm351_vm0 = vcmask 130048   ;;  %v783_v0 = vmov 0.0   ;;  %vm784_vm1 = vmmov 0   ;;  %s905_s16 = smov (!%p303_p5, %s769_s16), 1  ;;  %s907_s15 = smov (!%p305_p6, %s765_s15), 1  ;;  %vm348_vm2 = vcmask 7168  }
   0xf   : > { %679 = vmatprep.subr.bf16.mxu0 %v783_v0  ;;  %352 = vst.msk [vmem:[#allocation4] sm:$0xff] %vm351_vm0, %v783_v0  ;;  %681 = vmatprep.mubr.msk.bf16.mxu0 %vm784_vm1, %v783_v0  ;;  %s661_s22 = sshll.u32 %s905_s16, 1  ;;  %v785_v4 = vmov -inf   ;;  %v356_v5 = vld [vmem:[%s889_s0] sm:$0xff]  ;;  %vm405_vm3 = vcmask 64512   ;;  %v786_v12 = vmov 0  }
  0x10   : > { %685 = vmatprep.subr.bf16.mxu1 %v783_v0  ;;  %687 = vmatprep.mubr.msk.bf16.mxu1 %vm784_vm1, %v783_v0  ;;  %s308_s23 = sadd.s32 %s661_s22, %s907_s15  ;;  %349 = vst.msk [vmem:[#allocation2] sm:$0xff] %vm348_vm2, %v785_v4  ;;  %350 = vst.msk [vmem:[#allocation3] sm:$0xff] %vm348_vm2, %v783_v0  ;;  %vm440_vm4 = vcmask 1043456   ;;  %vm500_vm5 = vcmask 125952  }
  0x11   : > { %s843_s24 = sshll.u32 %s308_s23, 2  ;;  %735 = vset.pattern.permute.xlu0 %v786_v12  ;;  %736 = vset.pattern.permute.xlu1 %v786_v12 }
  0x12   : > { %s579_s27 = scalar_lea.vmem %s891_s2, %s843_s24  ;;  %s310_s30 = scalar_lea.vmem %s890_s1, %s843_s24 }
  0x13   : > { %v669_v1 = vld [vmem:[%s579_s27 + $0x10] sm:$0xf]  ;;  %v353_v3 = vld [vmem:[%s310_s30] sm:$0xf]  ;;  %s585_s9 = scalar_lea.vmem %s892_s3, %s843_s24  ;;  %s342_s12 = scalar_lea.vmem %s893_s4, %s843_s24 }
  0x14   : > { %v362_v2 = vsel %vm351_vm0, %v669_v1, 0  ;;  %v670_v17 = vld [vmem:[%s585_s9 + $0x20] sm:$0xf] }
  0x15   : > { %680 = vmatpush3.bf16.xpose.msra.mxu0 %v362_v2  ;;  %v442_v18 = vsel %vm440_vm4, %v670_v17, 0 }
  0x16   : > { %686 = vmatpush3.bf16.msra.mxu1 %v442_v18  ;;  %v429_v37 = vld [vmem:[#allocation4] sm:$0xff] }
  0x17   : > { %v404_v13 = vld [vmem:[#allocation2] sm:$0xff]  ;;  %v421_v27 = vld [vmem:[#allocation3] sm:$0xff] }
  0x1c   : > { %682 = vmatmul.mubr.msk.bf16.vlgmr.msra.gmra.mxu0 %vm351_vm0, %v353_v3 }
  0xdc   : > { %v398_v6 = vpop.f32.mrf.mxu0 }
  0xdd   : > { %v399_v7 = vadd.f32 %v398_v6, %v356_v5 }
  0xde   : > { %v683_v8 = vpop.f32.mrf.mxu0 }
  0xdf   : > { %v406_v9 = vsel %vm405_vm3, %v399_v7, -inf }
  0xe0   : > { %407 = vmax.xlane.f32.xlu0 %v406_v9  ;;  %v401_v10 = vpop.f32.mrf.mxu0 }
  0xe2   : > { %v684_v11 = vpop.f32.mrf.mxu0 }
 0x169   : > { %v408_v14 = vpop.xlane.xlu0 %407 }
 0x16a   : > { %v409_v15 = vmax.f32 %v404_v13, %v408_v14 }
 0x16c   : > { %v410_v16 = vsub.f32 %v404_v13, %v409_v15  ;;  %486 = vst.msk [vmem:[#allocation2] sm:$0xff] %vm348_vm2, %v409_v15  ;;  %415 = vperm.xlu0 %735, %v409_v15  }
 0x16e   : > { %v411_v25 = vmul.f32 1.442695, %v410_v16 }
 0x1e7   : > { %v416_v19 = vpop.permute.xlu0 %415 }
 0x1e8   : > { %v418_v20 = vsub.f32 %v399_v7, %v416_v19 }
 0x1ea   : > { %v419_v21 = vmul.f32 1.442695, %v418_v20 }
 0x1ec   : > { %737 = vpow2.f32 %v419_v21 }
 0x1ed   : > { %739 = vpow2.f32 %v411_v25 }
 0x1f9   : > { %v738_v22 = vpop.eup %737 }
 0x1fa   : > { %v423_v23 = vsel %vm405_vm3, %v738_v22, 0.0  ;;  %v436_v24 = vpack.c.bf16 %v738_v22, %v738_v22  ;;  %v740_v26 = vpop.eup %739 }
 0x1fb   : > { %424 = vadd.xlane.f32.xlu1 %v423_v23  ;;  %v422_v28 = vmul.f32 %v740_v26, %v421_v27 }
 0x1fc   : > { %688 = vmatmul.mubr.msk.bf16.vlgmr.msra.gmra.mxu1 %vm405_vm3, %v436_v24 }
 0x284   : > { %v425_v29 = vpop.xlane.xlu1 %424 }
 0x285   : > { %v426_v30 = vadd.f32 %v425_v29, %v422_v28 }
 0x287   : > { %428 = vst.msk [vmem:[#allocation3] sm:$0xff] %vm348_vm2, %v426_v30 }
 0x28e   : > { %v491_v31 = vld [vmem:[#allocation3] sm:$0xff] }
 0x28f   : > { %494 = vperm.xlu1 %736, %v491_v31  }
 0x293   : > { %432 = vperm.xlu1 %736, %v740_v26  }
 0x2bc   : > { %v478_v32 = vpop.f32.mrf.mxu1 }
 0x2be   : > { %v689_v33 = vpop.f32.mrf.mxu1 }
 0x2c0   : > { %v481_v34 = vpop.f32.mrf.mxu1 }
 0x2c2   : > { %v690_v35 = vpop.f32.mrf.mxu1 }
 0x30a   : > { %v495_v36 = vpop.permute.xlu1 %494 }
 0x30b   : > { %741 = vrcp.f32 %v495_v36 }
 0x30e   : > { %v433_v38 = vpop.permute.xlu1 %432 }
 0x30f   : > { %v435_v39 = vmul.f32 %v433_v38, %v429_v37 }
 0x311   : > { %v484_v40 = vadd.f32 %v478_v32, %v435_v39 }
 0x313   : > { %485 = vst.msk [vmem:[#allocation4] sm:$0xff] %vm351_vm0, %v484_v40 }
 0x318   : > { %v742_v41 = vpop.eup %741 }
 0x31a   : > { %v490_v42 = vld [vmem:[#allocation4] sm:$0xff] }
 0x31b   : > { %v498_v43 = vmul.f32 %v742_v41, %v490_v42 }
 0x31d   : > { %v499_v44 = vpack.c.bf16 %v498_v43, %v498_v43 }
 0x31f   : > { %501 = vst.msk [vmem:[%s342_s12] sm:$0xf] %vm500_vm5, %v499_v44 }
 0x320 PF: > { %s14_s19 = sadd.s32 1, %s781_s19   ;;  %s894_s15 = smov %s773_s17 }
 0x321   : > { %p11_p7 = scmp.ge.s32.totalorder %s14_s19, 6   ;;  %s895_s16 = smov %s777_s18 }
 0x322   : > { %s896_s17 = smov %s899_s20  ;;  %s897_s18 = smov %s903_s21 }
 0x323   :  { %13 = sbr.rel (!%p11_p7) target bundleno = 3 (0x3), region = 83 }

// kernel: transformer_forward.16
= control target key start
LH: loop header
LB: loop body
LE: loop exit
PB: predicated region body
PF: predicated region fallthrough
CT: control target
= control target key end

     0   :  { %v132_v0 = vmov 0.0   ;;  %vm133_vm0 = vmmov 0   ;;  %vm45_vm1 = vcmask 261120   ;;  %vm100_vm2 = vcmask 519168   ;;  %s172_s1 = inlined_call_operand.vmem [shape: bf16[32,64], index: 1, kind: input, shape index: {}]   ;;  %s173_s0 = inlined_call_operand.vmem [shape: bf16[16,32], index: 0, kind: input, shape index: {}]   ;;  %s174_s2 = inlined_call_operand.vmem [shape: f32[1,64], index: 2, kind: input, shape index: {}]   ;;  %s175_s3 = inlined_call_operand.vmem [shape: bf16[16,64], index: 3, kind: output, shape index: {}]  }
   0x1   :  { %119 = vmatprep.subr.bf16.mxu0 %v132_v0  ;;  %v129_v1 = vld [vmem:[%s172_s1 + $0x8] sm:$0xff]   ;;  %123 = vmatprep.mubr.msk.bf16.mxu0 %vm133_vm0, %v132_v0  ;;  %v130_v2 = vld [vmem:[%s172_s1] sm:$0xff]  }
   0x2   :  { %120 = vmatpush3.bf16.msra.mxu0 %v129_v1  ;;  %v131_v3 = vld [vmem:[%s173_s0] sm:$0xff]  }
   0x3   :  { %121 = vmatprep.subr.bf16.mxu0 %v132_v0  ;;  %v107_v4 = vld [vmem:[%s174_s2] ss:$0 sm:$0xff] }
   0x6   :  { %122 = vmatpush3.bf16.msra.mxu0 %v130_v2 }
   0x9   :  { %124 = vmatmul.mubr.msk.bf16.vlgmr.msra.gmra.mxu0 %vm45_vm1, %v131_v3 }
  0xc9   :  { %v83_v5 = vpop.f32.mrf.mxu0 }
  0xca   :  { %v84_v6 = vadd.f32 %v107_v4, %v83_v5 }
  0xcb   :  { %v125_v7 = vpop.f32.mrf.mxu0 }
  0xcc   :  { %v90_v8 = vmax.f32 %v84_v6, 0.0 }
  0xcd   :  { %v86_v9 = vpop.f32.mrf.mxu0 }
  0xce   :  { %v114_v10 = vpack.c.bf16 %v90_v8, %v90_v8  ;;  %v87_v11 = vadd.f32 %v107_v4, %v86_v9 }
  0xcf   :  { %v126_v12 = vpop.f32.mrf.mxu0 }
  0xd0   :  { %101 = vst.msk [vmem:[%s175_s3] sm:$0xf] %vm100_vm2, %v114_v10  ;;  %v91_v13 = vmax.f32 %v87_v11, 0.0 }
  0xd2   :  { %v115_v14 = vpack.c.bf16 %v91_v13, %v91_v13 }
  0xd4   :  { %102 = vst.msk [vmem:[%s175_s3 + $0x4] sm:$0xf] %vm100_vm2, %v115_v14 }

// kernel: transformer_forward.15
= control target key start
LH: loop header
LB: loop body
LE: loop exit
PB: predicated region body
PF: predicated region fallthrough
CT: control target
= control target key end

     0   :  { %v200_v0 = vmov 0.0   ;;  %vm201_vm0 = vmmov 0   ;;  %vm54_vm1 = vcmask 261120   ;;  %vm158_vm2 = vcmask 257024   ;;  %s269_s1 = inlined_call_operand.vmem [shape: bf16[32,32], index: 1, kind: input, shape index: {}]   ;;  %s270_s0 = inlined_call_operand.vmem [shape: bf16[16,32], index: 0, kind: input, shape index: {}]   ;;  %s271_s3 = inlined_call_operand.vmem [shape: bf16[16,32], index: 3, kind: input, shape index: {}]   ;;  %s272_s2 = inlined_call_operand.vmem [shape: f32[1,32], index: 2, kind: input, shape index: {}]   ;;  %s273_s4 = inlined_call_operand.vmem [shape: f32[1,32], index: 4, kind: input, shape index: {}]   ;;  %s274_s5 = inlined_call_operand.vmem [shape: f32[1,32], index: 5, kind: input, shape index: {}]   ;;  %s275_s6 = inlined_call_operand.vmem [shape: bf16[16,32], index: 6, kind: output, shape index: {}]  }
   0x1   :  { %183 = vmatprep.subr.bf16.mxu0 %v200_v0  ;;  %v193_v1 = vld [vmem:[%s269_s1 + $0x8] sm:$0xff]   ;;  %187 = vmatprep.mubr.msk.bf16.mxu0 %vm201_vm0, %v200_v0  ;;  %v194_v2 = vld [vmem:[%s269_s1] sm:$0xff]  }
   0x2   :  { %184 = vmatpush3.bf16.msra.mxu0 %v193_v1  ;;  %v195_v3 = vld [vmem:[%s270_s0] sm:$0xff]  }
   0x3   :  { %185 = vmatprep.subr.bf16.mxu0 %v200_v0  ;;  %v177_v4 = vld [vmem:[%s271_s3] sm:$0xff]  }
   0x4   :  { %v165_v5 = vld [vmem:[%s272_s2] ss:$0 sm:$0xff]  ;;  %v178_v6 = vunpack.c.l.bf16 %v177_v4  ;;  %v179_v11 = vunpack.c.h.bf16 %v177_v4 }
   0x5   :  { %v170_v35 = vld [vmem:[%s273_s4] ss:$0 sm:$0xff] }
   0x6   :  { %186 = vmatpush3.bf16.msra.mxu0 %v194_v2  ;;  %v171_v37 = vld [vmem:[%s274_s5] ss:$0 sm:$0xff] }
   0x9   :  { %188 = vmatmul.mubr.msk.bf16.vlgmr.msra.gmra.mxu0 %vm54_vm1, %v195_v3 }
  0xc9   :  { %v92_v7 = vpop.f32.mrf.mxu0 }
  0xca   :  { %v93_v8 = vadd.f32 %v165_v5, %v92_v7 }
  0xcb   :  { %v189_v9 = vpop.f32.mrf.mxu0 }
  0xcc   :  { %v103_v10 = vadd.f32 %v178_v6, %v93_v8 }
  0xcd   :  { %v95_v12 = vpop.f32.mrf.mxu0 }
  0xce   :  { %v96_v13 = vadd.f32 %v165_v5, %v95_v12  ;;  %v105_v14 = vsel %vm54_vm1, %v103_v10, 0.0 }
  0xcf   :  { %106 = vadd.xlane.f32.xlu0 %v105_v14  ;;  %v190_v15 = vpop.f32.mrf.mxu0 }
  0xd0   :  { %v104_v16 = vadd.f32 %v179_v11, %v96_v13 }
  0xd2   :  { %v108_v17 = vsel %vm54_vm1, %v104_v16, 0.0 }
  0xd3   :  { %109 = vadd.xlane.f32.xlu0 %v108_v17 }
 0x158   :  { %v107_v18 = vpop.xlane.xlu0 %106 }
 0x159   :  { %v112_v19 = vmul.f32 0.03125, %v107_v18 }
 0x15b   :  { %v114_v20 = vsub.f32 %v103_v10, %v112_v19 }
 0x15c   :  { %v110_v21 = vpop.xlane.xlu0 %109 }
 0x15d   :  { %v113_v22 = vmul.f32 0.03125, %v110_v21  ;;  %v116_v23 = vmul.f32 %v114_v20, %v114_v20 }
 0x15f   :  { %v115_v24 = vsub.f32 %v104_v16, %v113_v22  ;;  %v118_v25 = vsel %vm54_vm1, %v116_v23, 0.0 }
 0x160   :  { %119 = vadd.xlane.f32.xlu1 %v118_v25 }
 0x161   :  { %v117_v26 = vmul.f32 %v115_v24, %v115_v24 }
 0x163   :  { %v121_v27 = vsel %vm54_vm1, %v117_v26, 0.0 }
 0x164   :  { %122 = vadd.xlane.f32.xlu1 %v121_v27 }
 0x1e9   :  { %v120_v28 = vpop.xlane.xlu1 %119 }
 0x1ea   :  { %v124_v29 = vmul.f32 0.03125, %v120_v28 }
 0x1ec   :  { %v126_v30 = vadd.f32 1e-05, %v124_v29 }
 0x1ed   :  { %v123_v31 = vpop.xlane.xlu1 %122 }
 0x1ee   :  { %196 = vrsqrt.f32 %v126_v30  ;;  %v125_v32 = vmul.f32 0.03125, %v123_v31 }
 0x1f0   :  { %v127_v33 = vadd.f32 1e-05, %v125_v32 }
 0x1f2   :  { %198 = vrsqrt.f32 %v127_v33 }
 0x1fb   :  { %v197_v34 = vpop.eup %196 }
 0x1fc   :  { %v130_v36 = vmul.f32 %v197_v34, %v114_v20 }
 0x1fe   :  { %v139_v38 = vmul.f32 %v170_v35, %v130_v36 }
 0x1ff   :  { %v199_v39 = vpop.eup %198 }
 0x200   :  { %v148_v40 = vadd.f32 %v171_v37, %v139_v38  ;;  %v131_v41 = vmul.f32 %v199_v39, %v115_v24 }
 0x202   :  { %v174_v42 = vpack.c.bf16 %v148_v40, %v148_v40  ;;  %v140_v43 = vmul.f32 %v170_v35, %v131_v41 }
 0x204   :  { %159 = vst.msk [vmem:[%s275_s6] sm:$0xf] %vm158_vm2, %v174_v42  ;;  %v149_v44 = vadd.f32 %v171_v37, %v140_v43 }
 0x206   :  { %v175_v45 = vpack.c.bf16 %v149_v44, %v149_v44 }
 0x208   :  { %160 = vst.msk [vmem:[%s275_s6 + $0x4] sm:$0xf] %vm158_vm2, %v175_v45 }

// kernel: transformer_forward.17
= control target key start
LH: loop header
LB: loop body
LE: loop exit
PB: predicated region body
PF: predicated region fallthrough
CT: control target
= control target key end

     0   :  { %v227_v0 = vmov 0.0   ;;  %vm228_vm0 = vmmov 0   ;;  %vm70_vm1 = vcmask 523264   ;;  %vm121_vm2 = vcmask 261120   ;;  %s301_s1 = inlined_call_operand.vmem [shape: bf16[64,32], index: 1, kind: input, shape index: {}]   ;;  %s302_s0 = inlined_call_operand.vmem [shape: bf16[16,64], index: 0, kind: input, shape index: {}]   ;;  %s303_s3 = inlined_call_operand.vmem [shape: bf16[16,32], index: 3, kind: input, shape index: {}]   ;;  %s304_s2 = inlined_call_operand.vmem [shape: f32[1,32], index: 2, kind: input, shape index: {}]   ;;  %s305_s4 = inlined_call_operand.vmem [shape: f32[1,32], index: 4, kind: input, shape index: {}]   ;;  %s306_s5 = inlined_call_operand.vmem [shape: f32[1,32], index: 5, kind: input, shape index: {}]   ;;  %s307_s6 = inlined_call_operand.vmem [shape: bf16[16,32], index: 6, kind: output, shape index: {}]  }
   0x1   :  { %204 = vmatprep.subr.bf16.mxu0 %v227_v0  ;;  %v218_v1 = vld [vmem:[%s301_s1 + $0x18] sm:$0xff]   ;;  %212 = vmatprep.mubr.msk.bf16.mxu0 %vm228_vm0, %v227_v0  ;;  %v219_v2 = vld [vmem:[%s301_s1 + $0x10] sm:$0xff]   ;;  %v220_v3 = vld [vmem:[%s301_s1 + $0x8] sm:$0xff]   ;;  %vm175_vm3 = vcmask 257024  }
   0x2   :  { %205 = vmatpush3.bf16.msra.mxu0 %v218_v1  ;;  %v221_v4 = vld [vmem:[%s301_s1] sm:$0xff]  }
   0x3   :  { %206 = vmatprep.subr.bf16.mxu0 %v227_v0  ;;  %v222_v5 = vld [vmem:[%s302_s0] sm:$0xff]  }
   0x4   :  { %v196_v6 = vld [vmem:[%s303_s3] sm:$0xff]  }
   0x5   :  { %v182_v7 = vld [vmem:[%s304_s2] ss:$0 sm:$0xff]  ;;  %v197_v8 = vunpack.c.l.bf16 %v196_v6  ;;  %v198_v13 = vunpack.c.h.bf16 %v196_v6 }
   0x6   :  { %207 = vmatpush3.bf16.msra.mxu0 %v219_v2  ;;  %v189_v37 = vld [vmem:[%s305_s4] ss:$0 sm:$0xff] }
   0x7   :  { %208 = vmatprep.subr.bf16.mxu0 %v227_v0  ;;  %v190_v39 = vld [vmem:[%s306_s5] ss:$0 sm:$0xff] }
   0xa   :  { %209 = vmatpush3.bf16.msra.mxu0 %v220_v3 }
   0xb   :  { %210 = vmatprep.subr.bf16.mxu0 %v227_v0 }
   0xe   :  { %211 = vmatpush3.bf16.msra.mxu0 %v221_v4 }
  0x11   :  { %213 = vmatmul.mubr.msk.bf16.vlgmr.msra.gmra.mxu0 %vm70_vm1, %v222_v5 }
  0xd1   :  { %v108_v9 = vpop.f32.mrf.mxu0 }
  0xd2   :  { %v109_v10 = vadd.f32 %v182_v7, %v108_v9 }
  0xd3   :  { %v214_v11 = vpop.f32.mrf.mxu0 }
  0xd4   :  { %v119_v12 = vadd.f32 %v197_v8, %v109_v10 }
  0xd5   :  { %v111_v14 = vpop.f32.mrf.mxu0 }
  0xd6   :  { %v112_v15 = vadd.f32 %v182_v7, %v111_v14  ;;  %v122_v16 = vsel %vm121_vm2, %v119_v12, 0.0 }
  0xd7   :  { %123 = vadd.xlane.f32.xlu0 %v122_v16  ;;  %v215_v17 = vpop.f32.mrf.mxu0 }
  0xd8   :  { %v120_v18 = vadd.f32 %v198_v13, %v112_v15 }
  0xda   :  { %v125_v19 = vsel %vm121_vm2, %v120_v18, 0.0 }
  0xdb   :  { %126 = vadd.xlane.f32.xlu0 %v125_v19 }
 0x160   :  { %v124_v20 = vpop.xlane.xlu0 %123 }
 0x161   :  { %v129_v21 = vmul.f32 0.03125, %v124_v20 }
 0x163   :  { %v131_v22 = vsub.f32 %v119_v12, %v129_v21 }
 0x164   :  { %v127_v23 = vpop.xlane.xlu0 %126 }
 0x165   :  { %v130_v24 = vmul.f32 0.03125, %v127_v23  ;;  %v133_v25 = vmul.f32 %v131_v22, %v131_v22 }
 0x167   :  { %v132_v26 = vsub.f32 %v120_v18, %v130_v24  ;;  %v135_v27 = vsel %vm121_vm2, %v133_v25, 0.0 }
 0x168   :  { %136 = vadd.xlane.f32.xlu1 %v135_v27 }
 0x169   :  { %v134_v28 = vmul.f32 %v132_v26, %v132_v26 }
 0x16b   :  { %v138_v29 = vsel %vm121_vm2, %v134_v28, 0.0 }
 0x16c   :  { %139 = vadd.xlane.f32.xlu1 %v138_v29 }
 0x1f1   :  { %v137_v30 = vpop.xlane.xlu1 %136 }
 0x1f2   :  { %v141_v31 = vmul.f32 0.03125, %v137_v30 }
 0x1f4   :  { %v143_v32 = vadd.f32 1e-05, %v141_v31 }
 0x1f5   :  { %v140_v33 = vpop.xlane.xlu1 %139 }
 0x1f6   :  { %223 = vrsqrt.f32 %v143_v32  ;;  %v142_v34 = vmul.f32 0.03125, %v140_v33 }
 0x1f8   :  { %v144_v35 = vadd.f32 1e-05, %v142_v34 }
 0x1fa   :  { %225 = vrsqrt.f32 %v144_v35 }
 0x203   :  { %v224_v36 = vpop.eup %223 }
 0x204   :  { %v147_v38 = vmul.f32 %v224_v36, %v131_v22 }
 0x206   :  { %v156_v40 = vmul.f32 %v189_v37, %v147_v38 }
 0x207   :  { %v226_v41 = vpop.eup %225 }
 0x208   :  { %v165_v42 = vadd.f32 %v190_v39, %v156_v40  ;;  %v148_v43 = vmul.f32 %v226_v41, %v132_v26 }
 0x20a   :  { %v193_v44 = vpack.c.bf16 %v165_v42, %v165_v42  ;;  %v157_v45 = vmul.f32 %v189_v37, %v148_v43 }
 0x20c   :  { %176 = vst.msk [vmem:[%s307_s6] sm:$0xf] %vm175_vm3, %v193_v44  ;;  %v166_v46 = vadd.f32 %v190_v39, %v157_v45 }
 0x20e   :  { %v194_v47 = vpack.c.bf16 %v166_v46, %v166_v46 }
 0x210   :  { %177 = vst.msk [vmem:[%s307_s6 + $0x4] sm:$0xf] %vm175_vm3, %v194_v47 }

// kernel: transformer_forward.23
= control target key start
LH: loop header
LB: loop body
LE: loop exit
PB: predicated region body
PF: predicated region fallthrough
CT: control target
= control target key end

     0   :  { %v156_v1 = vmov 0.0   ;;  %vm157_vm0 = vmmov 0   ;;  %s196_s0 = inlined_call_operand.vmem [shape: bf16[16,32], index: 0, kind: input, shape index: {}]   ;;  %s197_s1 = inlined_call_operand.vmem [shape: bf16[32,64], index: 1, kind: input, shape index: {}]   ;;  %s198_s2 = inlined_call_operand.vmem [shape: f32[1,64], index: 2, kind: input, shape index: {}]   ;;  %s199_s3 = inlined_call_operand.hbm [shape: f32[16,64], index: 3, kind: output, shape index: {}]  }
   0x1   :  { %v131_v0 = vld [vmem:[%s197_s1 + $0x8] sm:$0xff]   ;;  %118 = vmatprep.subr.bf16.mxu0 %v156_v1  ;;  %v132_v2 = vld [vmem:[%s197_s1] sm:$0xff]   ;;  %122 = vmatprep.mubr.msk.bf16.mxu0 %vm157_vm0, %v156_v1 }
   0x2   :  { %119 = vmatpush3.bf16.msra.mxu0 %v131_v0 }
   0x3   :  { %120 = vmatprep.subr.bf16.mxu0 %v156_v1 }
   0x4   :  { %8 = vsyncpa [#allocation3], 0  ;;  %v133_v3 = vld [vmem:[%s196_s0] sm:$0xff]   ;;  %vm46_vm1 = vcmask 261120   ;;  %vm91_vm2 = vcmask 523264   ;;  %s158_s20 = smov [#allocation2]  }
   0x5   :  { %v110_v4 = vld [vmem:[%s198_s2] ss:$0 sm:$0xff]  ;;  %s99_s1 = sshll.u32 %s158_s20, 4  ;;  %s100_s1 = int_to_ptr.vmem [resolvable:$true] %s99_s1 }
   0x6   :  { %121 = vmatpush3.bf16.msra.mxu0 %v132_v2  ;;  %s134_s0 = scalar_lea.vmem %s100_s1, 256  ;;  %p139_p1 = scmp.lt.s32.totalorder %s100_s1, %s100_s1 }
   0x7   :  { %p135_p0 = scmp.ne.s32.totalorder %s100_s1, %s134_s0  ;;  %p140_p2 = scmp.lt.s32.totalorder %s134_s0, %s134_s0 }
   0x9   :  { %123 = vmatmul.mubr.msk.bf16.vlgmr.msra.gmra.mxu0 %vm46_vm1, %v133_v3  ;;  %p141_p3 = por %p140_p2, %p139_p1 }
   0xb   :  { %p142_p4 = pnand %p141_p3, %p135_p0 }
  0xc9   :  { %v84_v5 = vpop.f32.mrf.mxu0 }
  0xca   :  { %v85_v6 = vadd.f32 %v110_v4, %v84_v5 }
  0xcb   :  { %v124_v7 = vpop.f32.mrf.mxu0 }
  0xcc   :  { %92 = vst.msk [vmem:[#allocation2] sm:$0xff] %vm91_vm2, %v85_v6 }
  0xcd   :  { %v87_v8 = vpop.f32.mrf.mxu0 }
  0xce   :  { %v88_v9 = vadd.f32 %v110_v4, %v87_v8 }
  0xcf   :  { %v125_v10 = vpop.f32.mrf.mxu0 }
  0xd0   :  { %93 = vst.msk [vmem:[#allocation2 + $0x8] sm:$0xff] %vm91_vm2, %v88_v9 }
  0xd1   :  { %145 = shalt.err (!%p142_p4)
}
  0xd2   :  { %s159_s2 = smov 128   ;;  %s160_s21 = smov 8  }
  0xd3   :  { %105 = dma.vmem_to_hbm [thread:$0]  %s100_s1, 256, %s199_s3, [#allocation3], %s159_s2, %s159_s2, %s160_s21  }
  0xd4   :  { %154 = dma.done.wait [#allocation3], 256  }
  0xd5   :  { %155 = vsyncadd [#allocation3], 4294967040 }
  0xd6   :  { %109 = vsyncpa [#allocation3], 1 }

</bundles_post_ra>
